<compile_context>
chip_gen: v7x
topology: tpu7x:2x2x1
jax: 0.10.0
libtpu: 0.0.40
codegen_flags: <defaults>
</compile_context>

<pallas_src>
import jax
import jax.numpy as jnp
from jax import lax
from jax.experimental import pallas as pl
from jax.experimental.pallas import tpu as pltpu


# ----------------------------------------------------------------------------
# Pallas kernel
# ----------------------------------------------------------------------------
def _make_basic_conv_kernel(H, W, Cin, Co, k, relu):
    """Stride-1 'same' k x k conv + per-channel affine (+ReLU), one sample/step."""
    N = H * W
    p = k // 2
    OFF = p * W + p          # zero-halo rows above/below the body rows in scratch

    def kernel(x_ref, w_ref, scale_ref, offs_ref, out_ref, pad_ref):
        if p == 0:
            # 1x1 conv: a single (N, Cin) @ (Cin, Co) matmul, no padding needed.
            acc = jnp.dot(x_ref[0], w_ref[0],
                          preferred_element_type=jnp.float32)
        else:
            # Halo-only zeroing (2*OFF rows, not N); body rows fully overwritten.
            pad_ref[0:OFF, :] = jnp.zeros((OFF, Cin), jnp.float32)
            pad_ref[OFF + N:OFF + N + OFF, :] = jnp.zeros((OFF, Cin),
                                                          jnp.float32)
            pad_ref[OFF:OFF + N, :] = x_ref[0].astype(jnp.float32)

            # w-coordinate of each flattened pixel, kept as a small (N, 1).
            col = lax.broadcasted_iota(jnp.int32, (N, 1), 0) % W

            # k*k shifted matmuls, grouped by column shift dx so only one
            # wrap-mask select is applied per nonzero dx.
            acc = jnp.zeros((N, Co), jnp.float32)
            for dx in range(-p, p + 1):
                acc_d = jnp.zeros((N, Co), jnp.float32)
                for ky in range(k):
                    t = ky * k + (dx + p)
                    s = (ky - p) * W + dx
                    shifted = pad_ref[OFF + s:OFF + s + N, :]
                    acc_d = acc_d + jnp.dot(shifted.astype(jnp.bfloat16),
                                            w_ref[t],
                                            preferred_element_type=jnp.float32)
                if dx < 0:     # reads column w+dx: invalid where w < -dx
                    acc_d = jnp.where(col >= -dx, acc_d, 0.0)
                elif dx > 0:   # reads column w+dx: invalid where w >= W-dx
                    acc_d = jnp.where(col < W - dx, acc_d, 0.0)
                acc = acc + acc_d

        # Lane-dense writeback: one XLU transpose to (Co, N); per-channel
        # affine (conv bias / folded eval-BN) and ReLU stay in f32.
        y = jnp.transpose(acc, (1, 0))
        y = y * scale_ref[...] + offs_ref[...]
        if relu:
            y = jnp.maximum(y, 0.0)
        out_ref[0] = y

    return kernel


# ----------------------------------------------------------------------------
# Wrapper
# ----------------------------------------------------------------------------
def basic_conv_pallas(params, x, *, kernel_size, stride=1, bias=True,
                      norm=False, relu=True, transpose=False):
    if transpose:
        # TODO(synk): ConvTranspose2d branch of BasicConv is not implemented.
        raise NotImplementedError("transpose=True path not implemented")
    assert kernel_size % 2 == 1, "even kernel_size not supported"  # TODO(synk)

    B, Cin, H, W = x.shape
    k = kernel_size
    Co = params["w"].shape[0]
    N = H * W
    p = k // 2
    OFF = p * W + p

    # Per-channel affine folded from the conv bias / eval-mode BatchNorm.
    # (BasicConv sets bias=False whenever norm=True.)
    use_bias = bias and not norm
    if norm:
        eps = 1e-5
        scale = params["gamma"] / jnp.sqrt(params["var"] + eps)
        offs = params["beta"] - params["mean"] * scale
    else:
        scale = jnp.ones((Co,), jnp.float32)
        offs = params["b"] if use_bias else jnp.zeros((Co,), jnp.float32)
    scale = scale.reshape(Co, 1).astype(jnp.float32)
    offs = offs.reshape(Co, 1).astype(jnp.float32)

    # NCHW -> flattened NHWC, bf16 (halves HBM->VMEM bytes for the activations).
    x_f = jnp.transpose(x, (0, 2, 3, 1)).reshape(B, N, Cin).astype(jnp.bfloat16)
    # (Co, Cin, k, k) -> tap-major (k*k, Cin, Co), bf16 for the MXU.
    w_f = jnp.transpose(params["w"], (2, 3, 1, 0)).reshape(k * k, Cin, Co)
    w_f = w_f.astype(jnp.bfloat16)

    kernel = _make_basic_conv_kernel(H, W, Cin, Co, k, relu)

    out_flat = pl.pallas_call(
        kernel,
        out_shape=jax.ShapeDtypeStruct((B, Co, N), jnp.float32),
        grid_spec=pltpu.PrefetchScalarGridSpec(
            num_scalar_prefetch=0,
            grid=(B,),
            in_specs=[
                pl.BlockSpec((1, N, Cin), lambda b: (b, 0, 0)),
                pl.BlockSpec((k * k, Cin, Co), lambda b: (0, 0, 0)),
                pl.BlockSpec((Co, 1), lambda b: (0, 0)),
                pl.BlockSpec((Co, 1), lambda b: (0, 0)),
            ],
            out_specs=pl.BlockSpec((1, Co, N), lambda b: (b, 0, 0)),
            scratch_shapes=[pltpu.VMEM((N + 2 * OFF, Cin), jnp.float32)],
        ),
        compiler_params=pltpu.CompilerParams(
            dimension_semantics=("parallel",),
            vmem_limit_bytes=32 * 1024 * 1024,
        ),
    )(x_f, w_f, scale, offs)

    # (B, Co, N) is already NCHW-flat: free reshape, no transpose.
    out = out_flat.reshape(B, Co, H, W)
    if stride > 1:
        # For odd k with padding=k//2, the strided conv equals the stride-1
        # result subsampled.  TODO(synk): fold stride into the kernel for prod.
        out = out[:, :, ::stride, ::stride]
    return out


# ----------------------------------------------------------------------------
# Pure-JAX reference (correctness check only)
# ----------------------------------------------------------------------------
def basic_conv_reference(params, x, *, kernel_size, stride=1, bias=True,
                         norm=False, relu=True):
    p = kernel_size // 2
    y = lax.conv_general_dilated(
        x, params["w"], window_strides=(stride, stride),
        padding=((p, p), (p, p)),
        dimension_numbers=("NCHW", "OIHW", "NCHW"))
    if norm:
        eps = 1e-5
        scale = params["gamma"] / jnp.sqrt(params["var"] + eps)
        shift = params["beta"] - params["mean"] * scale
        y = y * scale[None, :, None, None] + shift[None, :, None, None]
    elif bias:
        y = y + params["b"][None, :, None, None]
    if relu:
        y = jnp.maximum(y, 0.0)
    return y


def init_basic_conv_params(key, in_channel, out_channel, kernel_size,
                           bias=True, norm=False):
    ks = jax.random.split(key, 6)
    params = {
        "w": 0.1 * jax.random.normal(
            ks[0], (out_channel, in_channel, kernel_size, kernel_size),
            jnp.float32),
    }
    if bias and not norm:
        params["b"] = 0.1 * jax.random.normal(ks[1], (out_channel,),
                                              jnp.float32)
    if norm:
        params["gamma"] = 1.0 + 0.1 * jax.random.normal(ks[2], (out_channel,),
                                                        jnp.float32)
        params["beta"] = 0.1 * jax.random.normal(ks[3], (out_channel,),
                                                 jnp.float32)
        params["mean"] = 0.1 * jax.random.normal(ks[4], (out_channel,),
                                                 jnp.float32)
        params["var"] = jnp.abs(
            1.0 + 0.1 * jax.random.normal(ks[5], (out_channel,), jnp.float32))
    return params


if __name__ == "__main__":
    B, Cin, Co = 2, 16, 32
    H = W = 16
    k, stride = 3, 1

    key = jax.random.PRNGKey(0)
    kx, kp = jax.random.split(key)
    x = jax.random.normal(kx, (B, Cin, H, W), jnp.float32)
    params = init_basic_conv_params(kp, Cin, Co, k, bias=True, norm=False)

    out = basic_conv_pallas(params, x, kernel_size=k, stride=stride,
                            bias=True, norm=False, relu=True)
    out = jax.block_until_ready(out)
    assert out.shape == (B, Co, H, W), out.shape

    ref = basic_conv_reference(params, x, kernel_size=k, stride=stride,
                               bias=True, norm=False, relu=True)
    max_err = float(jnp.max(jnp.abs(out - ref)))
    # bf16 matmul operands (f32 accumulation) vs an all-f32 reference.
    assert bool(jnp.allclose(out, ref, atol=5e-2, rtol=5e-2)), max_err

    print("KERNEL_OK")
</pallas_src>

<mosaic_0001>
module attributes {stable_mosaic.version = 11 : i64} {
  func.func @kernel(%arg0: i32, %arg1: memref<1x256x16xbf16, #tpu.memory_space<vmem>>, %arg2: memref<9x16x32xbf16, #tpu.memory_space<vmem>>, %arg3: memref<32x1xf32, #tpu.memory_space<vmem>>, %arg4: memref<32x1xf32, #tpu.memory_space<vmem>>, %arg5: memref<1x32x256xf32, #tpu.memory_space<vmem>>, %arg6: memref<290x16xf32, #tpu.memory_space<vmem>>) attributes {dimension_semantics = [#tpu.dimension_semantics<parallel>], iteration_bounds = array<i64: 2>, scalar_prefetch = 0 : i64, scratch_operands = 1 : i64, tpu.core_type = #tpu.core_type<tc>, window_params = [{transform_indices = @transform_0, window_bounds = array<i64: 1, 256, 16>}, {pipeline_mode = #tpu.pipeline_mode<synchronous>, transform_indices = @transform_1, window_bounds = array<i64: 9, 16, 32>}, {pipeline_mode = #tpu.pipeline_mode<synchronous>, transform_indices = @transform_2, window_bounds = array<i64: 32, 1>}, {pipeline_mode = #tpu.pipeline_mode<synchronous>, transform_indices = @transform_3, window_bounds = array<i64: 32, 1>}, {transform_indices = @transform_4, window_bounds = array<i64: 1, 32, 256>}]} {
    %cst = arith.constant 0.000000e+00 : f32
    %0 = vector.broadcast %cst : f32 to vector<17x16xf32>
    %c0 = arith.constant 0 : index
    %c0_0 = arith.constant 0 : index
    %1 = vector.load %arg6[%c0, %c0_0] : memref<290x16xf32, #tpu.memory_space<vmem>>, vector<17x16xf32>
    tpu.vector_store %arg6[%c0, %c0_0], %0 {strides = array<i32>} : memref<290x16xf32, #tpu.memory_space<vmem>>, vector<17x16xf32>,
    %cst_1 = arith.constant 0.000000e+00 : f32
    %2 = vector.broadcast %cst_1 : f32 to vector<17x16xf32>
    %c273 = arith.constant 273 : index
    %c0_2 = arith.constant 0 : index
    %3 = vector.load %arg6[%c273, %c0_2] : memref<290x16xf32, #tpu.memory_space<vmem>>, vector<17x16xf32>
    tpu.vector_store %arg6[%c273, %c0_2], %2 {strides = array<i32>} : memref<290x16xf32, #tpu.memory_space<vmem>>, vector<17x16xf32>,
    %c0_3 = arith.constant 0 : index
    %c0_4 = arith.constant 0 : index
    %c0_5 = arith.constant 0 : index
    %4 = vector.load %arg1[%c0_3, %c0_4, %c0_5] : memref<1x256x16xbf16, #tpu.memory_space<vmem>>, vector<1x256x16xbf16>
    %5 = vector.shape_cast %4 : vector<1x256x16xbf16> to vector<256x16xbf16>
    %6 = arith.extf %5 : vector<256x16xbf16> to vector<256x16xf32>
    %c17 = arith.constant 17 : index
    %c0_6 = arith.constant 0 : index
    %7 = vector.load %arg6[%c17, %c0_6] : memref<290x16xf32, #tpu.memory_space<vmem>>, vector<256x16xf32>
    tpu.vector_store %arg6[%c17, %c0_6], %6 {strides = array<i32>} : memref<290x16xf32, #tpu.memory_space<vmem>>, vector<256x16xf32>,
    %8 = tpu.iota {dimensions = array<i32: 0>} : vector<256x1xi32>
    %c16_i32 = arith.constant 16 : i32
    %c0_i32 = arith.constant 0 : i32
    %9 = arith.cmpi eq, %c16_i32, %c0_i32 : i32
    %c1_i32 = arith.constant 1 : i32
    %10 = arith.select %9, %c1_i32, %c16_i32 : i32
    %11 = vector.broadcast %10 : i32 to vector<256x1xi32>
    %12 = arith.remsi %8, %11 : vector<256x1xi32>
    %c0_i32_7 = arith.constant 0 : i32
    %13 = vector.broadcast %c0_i32_7 : i32 to vector<256x1xi32>
    %14 = arith.cmpi ne, %12, %13 : vector<256x1xi32>
    %c0_i32_8 = arith.constant 0 : i32
    %15 = vector.broadcast %c0_i32_8 : i32 to vector<256x1xi32>
    %16 = arith.cmpi slt, %12, %15 : vector<256x1xi32>
    %c0_i32_9 = arith.constant 0 : i32
    %17 = arith.cmpi slt, %10, %c0_i32_9 : i32
    %18 = vector.broadcast %17 : i1 to vector<256x1xi1>
    %19 = vector.broadcast %18 : vector<256x1xi1> to vector<256x1xi1>
    %20 = arith.xori %16, %19 : vector<256x1xi1>
    %21 = arith.andi %20, %14 : vector<256x1xi1>
    %22 = vector.broadcast %10 : i32 to vector<256x1xi32>
    %23 = arith.addi %12, %22 : vector<256x1xi32>
    %24 = arith.select %21, %23, %12 : vector<256x1xi1>, vector<256x1xi32>
    %cst_10 = arith.constant 0.000000e+00 : f32
    %25 = vector.broadcast %cst_10 : f32 to vector<256x32xf32>
    %cst_11 = arith.constant 0.000000e+00 : f32
    %26 = vector.broadcast %cst_11 : f32 to vector<256x32xf32>
    %c0_12 = arith.constant 0 : index
    %c0_13 = arith.constant 0 : index
    %27 = vector.load %arg6[%c0_12, %c0_13] : memref<290x16xf32, #tpu.memory_space<vmem>>, vector<256x16xf32>
    %28 = arith.truncf %27 : vector<256x16xf32> to vector<256x16xbf16>
    %c0_14 = arith.constant 0 : index
    %c0_15 = arith.constant 0 : index
    %c0_16 = arith.constant 0 : index
    %29 = vector.load %arg2[%c0_14, %c0_15, %c0_16] : memref<9x16x32xbf16, #tpu.memory_space<vmem>>, vector<1x16x32xbf16>
    %30 = vector.shape_cast %29 : vector<1x16x32xbf16> to vector<16x32xbf16>
    %cst_17 = arith.constant dense<0.000000e+00> : vector<256x32xf32>
    %31 = tpu.matmul %28, %30, %cst_17 {dimension_numbers = #tpu.dot_dimension_numbers<[1], [0], [0], [1], [0, 0, 1, 1], [], []>} : vector<256x16xbf16>, vector<16x32xbf16>, vector<256x32xf32> -> vector<256x32xf32>
    %32 = arith.addf %26, %31 : vector<256x32xf32>
    %c16 = arith.constant 16 : index
    %c0_18 = arith.constant 0 : index
    %33 = vector.load %arg6[%c16, %c0_18] : memref<290x16xf32, #tpu.memory_space<vmem>>, vector<256x16xf32>
    %34 = arith.truncf %33 : vector<256x16xf32> to vector<256x16xbf16>
    %c3 = arith.constant 3 : index
    %c0_19 = arith.constant 0 : index
    %c0_20 = arith.constant 0 : index
    %35 = vector.load %arg2[%c3, %c0_19, %c0_20] : memref<9x16x32xbf16, #tpu.memory_space<vmem>>, vector<1x16x32xbf16>
    %36 = vector.shape_cast %35 : vector<1x16x32xbf16> to vector<16x32xbf16>
    %cst_21 = arith.constant dense<0.000000e+00> : vector<256x32xf32>
    %37 = tpu.matmul %34, %36, %cst_21 {dimension_numbers = #tpu.dot_dimension_numbers<[1], [0], [0], [1], [0, 0, 1, 1], [], []>} : vector<256x16xbf16>, vector<16x32xbf16>, vector<256x32xf32> -> vector<256x32xf32>
    %38 = arith.addf %32, %37 : vector<256x32xf32>
    %c32 = arith.constant 32 : index
    %c0_22 = arith.constant 0 : index
    %39 = vector.load %arg6[%c32, %c0_22] : memref<290x16xf32, #tpu.memory_space<vmem>>, vector<256x16xf32>
    %40 = arith.truncf %39 : vector<256x16xf32> to vector<256x16xbf16>
    %c6 = arith.constant 6 : index
    %c0_23 = arith.constant 0 : index
    %c0_24 = arith.constant 0 : index
    %41 = vector.load %arg2[%c6, %c0_23, %c0_24] : memref<9x16x32xbf16, #tpu.memory_space<vmem>>, vector<1x16x32xbf16>
    %42 = vector.shape_cast %41 : vector<1x16x32xbf16> to vector<16x32xbf16>
    %cst_25 = arith.constant dense<0.000000e+00> : vector<256x32xf32>
    %43 = tpu.matmul %40, %42, %cst_25 {dimension_numbers = #tpu.dot_dimension_numbers<[1], [0], [0], [1], [0, 0, 1, 1], [], []>} : vector<256x16xbf16>, vector<16x32xbf16>, vector<256x32xf32> -> vector<256x32xf32>
    %44 = arith.addf %38, %43 : vector<256x32xf32>
    %c1_i32_26 = arith.constant 1 : i32
    %45 = vector.broadcast %c1_i32_26 : i32 to vector<256x1xi32>
    %46 = arith.cmpi sge, %24, %45 : vector<256x1xi32>
    %cst_27 = arith.constant 0.000000e+00 : f32
    %47 = vector.shape_cast %46 : vector<256x1xi1> to vector<256x1xi1>
    %48 = vector.broadcast %47 : vector<256x1xi1> to vector<256x32xi1>
    %49 = vector.broadcast %cst_27 : f32 to vector<256x32xf32>
    %50 = arith.select %48, %44, %49 : vector<256x32xi1>, vector<256x32xf32>
    %51 = arith.addf %25, %50 : vector<256x32xf32>
    %cst_28 = arith.constant 0.000000e+00 : f32
    %52 = vector.broadcast %cst_28 : f32 to vector<256x32xf32>
    %c1 = arith.constant 1 : index
    %c0_29 = arith.constant 0 : index
    %53 = vector.load %arg6[%c1, %c0_29] : memref<290x16xf32, #tpu.memory_space<vmem>>, vector<256x16xf32>
    %54 = arith.truncf %53 : vector<256x16xf32> to vector<256x16xbf16>
    %c1_30 = arith.constant 1 : index
    %c0_31 = arith.constant 0 : index
    %c0_32 = arith.constant 0 : index
    %55 = vector.load %arg2[%c1_30, %c0_31, %c0_32] : memref<9x16x32xbf16, #tpu.memory_space<vmem>>, vector<1x16x32xbf16>
    %56 = vector.shape_cast %55 : vector<1x16x32xbf16> to vector<16x32xbf16>
    %cst_33 = arith.constant dense<0.000000e+00> : vector<256x32xf32>
    %57 = tpu.matmul %54, %56, %cst_33 {dimension_numbers = #tpu.dot_dimension_numbers<[1], [0], [0], [1], [0, 0, 1, 1], [], []>} : vector<256x16xbf16>, vector<16x32xbf16>, vector<256x32xf32> -> vector<256x32xf32>
    %58 = arith.addf %52, %57 : vector<256x32xf32>
    %c17_34 = arith.constant 17 : index
    %c0_35 = arith.constant 0 : index
    %59 = vector.load %arg6[%c17_34, %c0_35] : memref<290x16xf32, #tpu.memory_space<vmem>>, vector<256x16xf32>
    %60 = arith.truncf %59 : vector<256x16xf32> to vector<256x16xbf16>
    %c4 = arith.constant 4 : index
    %c0_36 = arith.constant 0 : index
    %c0_37 = arith.constant 0 : index
    %61 = vector.load %arg2[%c4, %c0_36, %c0_37] : memref<9x16x32xbf16, #tpu.memory_space<vmem>>, vector<1x16x32xbf16>
    %62 = vector.shape_cast %61 : vector<1x16x32xbf16> to vector<16x32xbf16>
    %cst_38 = arith.constant dense<0.000000e+00> : vector<256x32xf32>
    %63 = tpu.matmul %60, %62, %cst_38 {dimension_numbers = #tpu.dot_dimension_numbers<[1], [0], [0], [1], [0, 0, 1, 1], [], []>} : vector<256x16xbf16>, vector<16x32xbf16>, vector<256x32xf32> -> vector<256x32xf32>
    %64 = arith.addf %58, %63 : vector<256x32xf32>
    %c33 = arith.constant 33 : index
    %c0_39 = arith.constant 0 : index
    %65 = vector.load %arg6[%c33, %c0_39] : memref<290x16xf32, #tpu.memory_space<vmem>>, vector<256x16xf32>
    %66 = arith.truncf %65 : vector<256x16xf32> to vector<256x16xbf16>
    %c7 = arith.constant 7 : index
    %c0_40 = arith.constant 0 : index
    %c0_41 = arith.constant 0 : index
    %67 = vector.load %arg2[%c7, %c0_40, %c0_41] : memref<9x16x32xbf16, #tpu.memory_space<vmem>>, vector<1x16x32xbf16>
    %68 = vector.shape_cast %67 : vector<1x16x32xbf16> to vector<16x32xbf16>
    %cst_42 = arith.constant dense<0.000000e+00> : vector<256x32xf32>
    %69 = tpu.matmul %66, %68, %cst_42 {dimension_numbers = #tpu.dot_dimension_numbers<[1], [0], [0], [1], [0, 0, 1, 1], [], []>} : vector<256x16xbf16>, vector<16x32xbf16>, vector<256x32xf32> -> vector<256x32xf32>
    %70 = arith.addf %64, %69 : vector<256x32xf32>
    %71 = arith.addf %51, %70 : vector<256x32xf32>
    %cst_43 = arith.constant 0.000000e+00 : f32
    %72 = vector.broadcast %cst_43 : f32 to vector<256x32xf32>
    %c2 = arith.constant 2 : index
    %c0_44 = arith.constant 0 : index
    %73 = vector.load %arg6[%c2, %c0_44] : memref<290x16xf32, #tpu.memory_space<vmem>>, vector<256x16xf32>
    %74 = arith.truncf %73 : vector<256x16xf32> to vector<256x16xbf16>
    %c2_45 = arith.constant 2 : index
    %c0_46 = arith.constant 0 : index
    %c0_47 = arith.constant 0 : index
    %75 = vector.load %arg2[%c2_45, %c0_46, %c0_47] : memref<9x16x32xbf16, #tpu.memory_space<vmem>>, vector<1x16x32xbf16>
    %76 = vector.shape_cast %75 : vector<1x16x32xbf16> to vector<16x32xbf16>
    %cst_48 = arith.constant dense<0.000000e+00> : vector<256x32xf32>
    %77 = tpu.matmul %74, %76, %cst_48 {dimension_numbers = #tpu.dot_dimension_numbers<[1], [0], [0], [1], [0, 0, 1, 1], [], []>} : vector<256x16xbf16>, vector<16x32xbf16>, vector<256x32xf32> -> vector<256x32xf32>
    %78 = arith.addf %72, %77 : vector<256x32xf32>
    %c18 = arith.constant 18 : index
    %c0_49 = arith.constant 0 : index
    %79 = vector.load %arg6[%c18, %c0_49] : memref<290x16xf32, #tpu.memory_space<vmem>>, vector<256x16xf32>
    %80 = arith.truncf %79 : vector<256x16xf32> to vector<256x16xbf16>
    %c5 = arith.constant 5 : index
    %c0_50 = arith.constant 0 : index
    %c0_51 = arith.constant 0 : index
    %81 = vector.load %arg2[%c5, %c0_50, %c0_51] : memref<9x16x32xbf16, #tpu.memory_space<vmem>>, vector<1x16x32xbf16>
    %82 = vector.shape_cast %81 : vector<1x16x32xbf16> to vector<16x32xbf16>
    %cst_52 = arith.constant dense<0.000000e+00> : vector<256x32xf32>
    %83 = tpu.matmul %80, %82, %cst_52 {dimension_numbers = #tpu.dot_dimension_numbers<[1], [0], [0], [1], [0, 0, 1, 1], [], []>} : vector<256x16xbf16>, vector<16x32xbf16>, vector<256x32xf32> -> vector<256x32xf32>
    %84 = arith.addf %78, %83 : vector<256x32xf32>
    %c34 = arith.constant 34 : index
    %c0_53 = arith.constant 0 : index
    %85 = vector.load %arg6[%c34, %c0_53] : memref<290x16xf32, #tpu.memory_space<vmem>>, vector<256x16xf32>
    %86 = arith.truncf %85 : vector<256x16xf32> to vector<256x16xbf16>
    %c8 = arith.constant 8 : index
    %c0_54 = arith.constant 0 : index
    %c0_55 = arith.constant 0 : index
    %87 = vector.load %arg2[%c8, %c0_54, %c0_55] : memref<9x16x32xbf16, #tpu.memory_space<vmem>>, vector<1x16x32xbf16>
    %88 = vector.shape_cast %87 : vector<1x16x32xbf16> to vector<16x32xbf16>
    %cst_56 = arith.constant dense<0.000000e+00> : vector<256x32xf32>
    %89 = tpu.matmul %86, %88, %cst_56 {dimension_numbers = #tpu.dot_dimension_numbers<[1], [0], [0], [1], [0, 0, 1, 1], [], []>} : vector<256x16xbf16>, vector<16x32xbf16>, vector<256x32xf32> -> vector<256x32xf32>
    %90 = arith.addf %84, %89 : vector<256x32xf32>
    %c15_i32 = arith.constant 15 : i32
    %91 = vector.broadcast %c15_i32 : i32 to vector<256x1xi32>
    %92 = arith.cmpi slt, %24, %91 : vector<256x1xi32>
    %cst_57 = arith.constant 0.000000e+00 : f32
    %93 = vector.shape_cast %92 : vector<256x1xi1> to vector<256x1xi1>
    %94 = vector.broadcast %93 : vector<256x1xi1> to vector<256x32xi1>
    %95 = vector.broadcast %cst_57 : f32 to vector<256x32xf32>
    %96 = arith.select %94, %90, %95 : vector<256x32xi1>, vector<256x32xf32>
    %97 = arith.addf %71, %96 : vector<256x32xf32>
    %98 = tpu.transpose %97, [1, 0] : vector<256x32xf32> -> vector<32x256xf32>
    %c0_58 = arith.constant 0 : index
    %c0_59 = arith.constant 0 : index
    %99 = vector.load %arg3[%c0_58, %c0_59] : memref<32x1xf32, #tpu.memory_space<vmem>>, vector<32x1xf32>
    %100 = vector.broadcast %99 : vector<32x1xf32> to vector<32x256xf32>
    %101 = arith.mulf %98, %100 : vector<32x256xf32>
    %c0_60 = arith.constant 0 : index
    %c0_61 = arith.constant 0 : index
    %102 = vector.load %arg4[%c0_60, %c0_61] : memref<32x1xf32, #tpu.memory_space<vmem>>, vector<32x1xf32>
    %103 = vector.broadcast %102 : vector<32x1xf32> to vector<32x256xf32>
    %104 = arith.addf %101, %103 : vector<32x256xf32>
    %cst_62 = arith.constant 0.000000e+00 : f32
    %105 = vector.broadcast %cst_62 : f32 to vector<32x256xf32>
    %106 = arith.maximumf %104, %105 : vector<32x256xf32>
    %c0_63 = arith.constant 0 : index
    %c0_64 = arith.constant 0 : index
    %c0_65 = arith.constant 0 : index
    %107 = vector.load %arg5[%c0_63, %c0_64, %c0_65] : memref<1x32x256xf32, #tpu.memory_space<vmem>>, vector<1x32x256xf32>
    %108 = vector.shape_cast %107 : vector<1x32x256xf32> to vector<32x256xf32>
    %109 = vector.shape_cast %106 : vector<32x256xf32> to vector<1x32x256xf32>
    tpu.vector_store %arg5[%c0_63, %c0_64, %c0_65], %109 {strides = array<i32>} : memref<1x32x256xf32, #tpu.memory_space<vmem>>, vector<1x32x256xf32>,
    return
  }
  func.func @transform_0(%arg0: i32) -> (i32, i32, i32) {
    %c0_i32 = arith.constant 0 : i32
    %c0_i32_0 = arith.constant 0 : i32
    %c0_i32_1 = arith.constant 0 : i32
    return %arg0, %c0_i32, %c0_i32_0 : i32, i32, i32
  }
  func.func @transform_1(%arg0: i32) -> (i32, i32, i32) {
    %c0_i32 = arith.constant 0 : i32
    %c0_i32_0 = arith.constant 0 : i32
    %c0_i32_1 = arith.constant 0 : i32
    %c0_i32_2 = arith.constant 0 : i32
    return %c0_i32, %c0_i32_0, %c0_i32_1 : i32, i32, i32
  }
  func.func @transform_2(%arg0: i32) -> (i32, i32) {
    %c0_i32 = arith.constant 0 : i32
    %c0_i32_0 = arith.constant 0 : i32
    %c0_i32_1 = arith.constant 0 : i32
    return %c0_i32, %c0_i32_0 : i32, i32
  }
  func.func @transform_3(%arg0: i32) -> (i32, i32) {
    %c0_i32 = arith.constant 0 : i32
    %c0_i32_0 = arith.constant 0 : i32
    %c0_i32_1 = arith.constant 0 : i32
    return %c0_i32, %c0_i32_0 : i32, i32
  }
  func.func @transform_4(%arg0: i32) -> (i32, i32, i32) {
    %c0_i32 = arith.constant 0 : i32
    %c0_i32_0 = arith.constant 0 : i32
    %c0_i32_1 = arith.constant 0 : i32
    return %arg0, %c0_i32, %c0_i32_0 : i32, i32, i32
  }
}

</mosaic_0001>

<bundles_post_ra>
// kernel: tpu_custom_call.1
= control target key start
LH: loop header
LB: loop body
LE: loop exit
PB: predicated region body
PF: predicated region fallthrough
CT: control target
= control target key end

     0   :  { %9 = vsyncpa [#allocation4], 0  ;;  %s5353_s0 = inlined_call_operand.vmem [shape: bf16[2,256,16], index: 0, kind: input, shape index: {}]   ;;  %s5354_s1 = inlined_call_operand.vmem [shape: bf16[9,16,32], index: 1, kind: input, shape index: {}]   ;;  %s5355_s2 = inlined_call_operand.vmem [shape: f32[32,1], index: 2, kind: input, shape index: {}]   ;;  %s5356_s3 = inlined_call_operand.vmem [shape: f32[32,1], index: 3, kind: input, shape index: {}]   ;;  %s5357_s4 = inlined_call_operand.hbm [shape: f32[2,32,256], index: 4, kind: output, shape index: {}]  }
   0x1   :  { %11 = vsyncpa [#allocation4 + $0x1], 0  ;;  %s4572_s15 = smov 0   ;;  %s4574_s16 = smov 0  }
   0x2   :  { %s4576_s17 = smov 0   ;;  %s4578_s18 = smov 0  }
   0x3 LB: > { %s4593_s19 = sadd.s32 4294967295, %s4540_s18   ;;  %s3509_s20 = sadd.s32 4294967294, %s4540_s18   ;;  %s4540_s18 = sphi %s4578_s18, %s5385_s18   ;;  %s4536_s17 = sphi %s4576_s17, %s5384_s17   ;;  %s4532_s16 = sphi %s4574_s16, %s5383_s16   ;;  %s4528_s15 = sphi %s4572_s15, %s5382_s15  }
   0x4   : > { %s4597_s21 = sadd.s32 1, %s4540_s18   ;;  %s113_s22 = sadd.s32 1, %s4536_s17 }
   0x5   : > { %s110_s23 = ssub.s32 %s4540_s18, %s4597_s21  ;;  %p123_p0 = scmp.ne.s32.totalorder %s4536_s17, %s4532_s16 }
   0x6   : > { %p111_p1 = scmp.eq.s32.totalorder %s110_s23, 0  ;;  %p124_p2 = scmp.eq.s32.totalorder %s4593_s19, 1 }
   0x7   : > { %p129_p3 = scmp.ne.s32.totalorder %s4532_s16, %s4528_s15  ;;  %p130_p4 = scmp.eq.s32.totalorder %s3509_s20, 1 }
   0x8   : > { %s4608_s24 = scalar_select %p111_p1, %s4536_s17, %s113_s22  }
   0x9   : > { %p4610_p5 = por %p124_p2, %p123_p0  ;;  %p4614_p6 = por %p130_p4, %p129_p3 }
   0xa   : > { %p3512_p7 = scmp.ge.s32.totalorder %s4540_s18, 1  ;;  %p165_p8 = scmp.lt.s32.totalorder %s4540_s18, 3 }
   0xc   : > { %p166_p9 = pnand %p3512_p7, %p165_p8 }
   0xd   : > { %v4469_v0 = vld [vmem:[%s5354_s1 + $0x18] sm:$0xff] (!%p166_p9)   ;;  %vm197_vm0 = vcmask (!%p166_p9), 130048   ;;  %v4626_v1 = vld [vmem:[%s5354_s1] sm:$0xff] (!%p166_p9)   ;;  %v4542_v2 = vmov (!%p166_p9), 0.0   ;;  %p191_p10 = scmp.lt.s32.totalorder (!%p166_p9), %s4593_s19, 1  ;;  %vm200_vm1 = vcmask (!%p166_p9), 122880  }
   0xe   : > { %169 = sbr.rel (%p166_p9) target bundleno = 749 (0x2ed), region = 36  ;;  %3924 = vmatprep.subr.bf16.mxu1 (!%p166_p9), %v4469_v0  ;;  %198 = vst.msk [vmem:[#allocation2] sm:$0xff] (!%p166_p9), %vm197_vm0, %v4542_v2  ;;  %199 = vst.msk [vmem:[#allocation2 + $0x8] sm:$0xff] (!%p166_p9), %vm197_vm0, %v4542_v2  ;;  %3958 = vmatprep.subr.bf16.mxu0 (!%p166_p9), %v4626_v1  ;;  %v4637_v3 = vld [vmem:[%s5354_s1 + $0x30] sm:$0xff] (!%p166_p9)   ;;  %s188_s6 = sand.u32 (!%p166_p9), 1, %s4532_s16  }
   0xf   : > { %202 = vst.msk [vmem:[#allocation2 + $0x111] sm:$0xff] (!%p166_p9), %vm197_vm0, %v4542_v2  ;;  %203 = vst.msk [vmem:[#allocation2 + $0x119] sm:$0xff] (!%p166_p9), %vm197_vm0, %v4542_v2  ;;  %3925 = vmatpush3.bf16.msra.mxu1 (!%p166_p9), %v4469_v0  ;;  %3959 = vmatpush3.bf16.msra.mxu0 (!%p166_p9), %v4626_v1  ;;  %v4472_v0 = vld [vmem:[%s5354_s1 + $0x28] sm:$0xff] (!%p166_p9)   ;;  %s3691_s9 = sshll.u32 (!%p166_p9), %s4593_s19, 10  ;;  %s4544_s20 = smov (!%p166_p9), [#allocation3]  }
  0x10   : > { %201 = vst.msk [vmem:[#allocation2 + $0x10] sm:$0x1] (!%p166_p9), %vm200_vm1, %v4542_v2  ;;  %204 = vst.msk [vmem:[#allocation2 + $0x121] sm:$0x1] (!%p166_p9), %vm200_vm1, %v4542_v2  ;;  %4230 = vmatprep.subr.bf16.mxu1 (!%p166_p9), %v4626_v1  ;;  %3992 = vmatprep.subr.bf16.mxu0 (!%p166_p9), %v4637_v3  ;;  %v4705_v2 = vld [vmem:[%s5354_s1 + $0x20] sm:$0xff] (!%p166_p9)   ;;  %s5304_s13 = scalar_lea.hbm (!%p166_p9), %s5357_s4, %s3691_s9  ;;  %s4482_s22 = sshll.u32 (!%p166_p9), %s4544_s20, 4  ;;  %s4483_s22 = int_to_ptr.vmem [resolvable:$false] %s4482_s22 }
  0x11   : > { %s4484_s23 = scalar_lea.vmem (!%p166_p9), %s4483_s22, 2048 }
  0x15   : > { %s192_s7 = scalar_select %p191_p10, %s4593_s19, 1  ;;  %v718_v7 = vld [vmem:[#allocation2] sm:$0xff]  ;;  %v719_v8 = vld [vmem:[#allocation2 + $0x8] sm:$0xff] }
  0x16   : > { %v750_v14 = vpack.c.bf16 %v719_v8, %v718_v7  ;;  %s5312_s19 = scalar_lea.sflag [#allocation4], %s188_s6 }
  0x17   : > { %s3690_s8 = sshll.u32 %s192_s7, 7  ;;  %s3513_s7 = sshll.u32 %s188_s6, 6 }
  0x18   : > { %s4646_s11 = scalar_lea.vmem %s5353_s0, %s3690_s8  ;;  %3960 = vmatprep.mubr.msk.bf16.mxu0 %vm197_vm0, %v750_v14  ;;  %s5291_s8 = scalar_lea.vmem [#allocation3], %s3513_s7 }
  0x19   : > { %v3693_v4 = vld [vmem:[%s4646_s11] sm:$0xff]   ;;  %v3756_v5 = vld [vmem:[%s4646_s11 + $0x8] sm:$0xff]   ;;  %v3757_v6 = vld [vmem:[%s4646_s11 + $0x10] sm:$0xff]   ;;  %s3447_s10 = sshll.u32 %s5291_s8, 4  ;;  %s5306_s10 = int_to_ptr.vmem [resolvable:$true] %s3447_s10 }
  0x1a   : > { %v3694_v9 = vunpack.c.l.bf16 %v3693_v4  ;;  %v3695_v10 = vunpack.c.h.bf16 %v3693_v4  ;;  %v3698_v11 = vunpack.c.l.bf16 %v3756_v5  ;;  %v3699_v12 = vunpack.c.h.bf16 %v3756_v5  ;;  %v3758_v13 = vld [vmem:[%s4646_s11 + $0x18] sm:$0xff]   ;;  %v3759_v18 = vld [vmem:[%s4646_s11 + $0x20] sm:$0xff]   ;;  %v3760_v19 = vld [vmem:[%s4646_s11 + $0x28] sm:$0xff]   ;;  %s4478_s14 = scalar_lea.vmem %s5306_s10, 1024  ;;  %p4485_p0 = scmp.lt.s32.totalorder %s5306_s10, %s4483_s22 }
  0x1b   : > { %v3702_v15 = vunpack.c.l.bf16 %v3757_v6  ;;  %v3703_v16 = vunpack.c.h.bf16 %v3757_v6  ;;  %v3706_v17 = vunpack.c.l.bf16 %v3758_v13  ;;  %v3761_v20 = vld [vmem:[%s4646_s11 + $0x30] sm:$0xff]   ;;  %v3707_v21 = vunpack.c.h.bf16 %v3758_v13  ;;  %v3762_v25 = vld [vmem:[%s4646_s11 + $0x38] sm:$0xff]   ;;  %v3763_v26 = vld [vmem:[%s4646_s11 + $0x40] sm:$0xff]   ;;  %p4479_p11 = scmp.ne.s32.totalorder %s5306_s10, %s4478_s14  ;;  %p4486_p1 = scmp.lt.s32.totalorder %s4484_s23, %s4478_s14 }
  0x1c   : > { %269 = vst.msk [vmem:[#allocation2 + $0x11] sm:$0xff] %vm197_vm0, %v3694_v9  ;;  %270 = vst.msk [vmem:[#allocation2 + $0x19] sm:$0xff] %vm197_vm0, %v3695_v10  ;;  %v3710_v22 = vunpack.c.l.bf16 %v3759_v18  ;;  %v3711_v23 = vunpack.c.h.bf16 %v3759_v18  ;;  %v3714_v24 = vunpack.c.l.bf16 %v3760_v19  ;;  %v3764_v27 = vld [vmem:[%s4646_s11 + $0x48] sm:$0xff]   ;;  %v3715_v28 = vunpack.c.h.bf16 %v3760_v19  ;;  %v3765_v32 = vld [vmem:[%s4646_s11 + $0x50] sm:$0xff]  }
  0x1d   : > { %271 = vst.msk [vmem:[#allocation2 + $0x21] sm:$0xff] %vm197_vm0, %v3698_v11  ;;  %272 = vst.msk [vmem:[#allocation2 + $0x29] sm:$0xff] %vm197_vm0, %v3699_v12  ;;  %v3718_v29 = vunpack.c.l.bf16 %v3761_v20  ;;  %v3719_v30 = vunpack.c.h.bf16 %v3761_v20  ;;  %v3722_v31 = vunpack.c.l.bf16 %v3762_v25  ;;  %v3766_v33 = vld [vmem:[%s4646_s11 + $0x58] sm:$0xff]   ;;  %v3767_v34 = vld [vmem:[%s4646_s11 + $0x60] sm:$0xff]   ;;  %v3723_v35 = vunpack.c.h.bf16 %v3762_v25  ;;  %p4480_p12 = pnand %p4479_p11, %p4610_p5  ;;  %p4487_p2 = por %p4486_p1, %p4485_p0 }
  0x1e   : > { %273 = vst.msk [vmem:[#allocation2 + $0x31] sm:$0xff] %vm197_vm0, %v3702_v15  ;;  %274 = vst.msk [vmem:[#allocation2 + $0x39] sm:$0xff] %vm197_vm0, %v3703_v16  ;;  %v3726_v36 = vunpack.c.l.bf16 %v3763_v26  ;;  %v3727_v37 = vunpack.c.h.bf16 %v3763_v26  ;;  %v3730_v38 = vunpack.c.l.bf16 %v3764_v27  ;;  %v3768_v39 = vld [vmem:[%s4646_s11 + $0x68] sm:$0xff]   ;;  %v3769_v40 = vld [vmem:[%s4646_s11 + $0x70] sm:$0xff]   ;;  %v3731_v42 = vunpack.c.h.bf16 %v3764_v27 }
  0x1f   : > { %275 = vst.msk [vmem:[#allocation2 + $0x41] sm:$0xff] %vm197_vm0, %v3706_v17  ;;  %276 = vst.msk [vmem:[#allocation2 + $0x49] sm:$0xff] %vm197_vm0, %v3707_v21  ;;  %v3770_v41 = vld [vmem:[%s4646_s11 + $0x78] sm:$0xff]   ;;  %v3734_v43 = vunpack.c.l.bf16 %v3765_v32  ;;  %v3735_v44 = vunpack.c.h.bf16 %v3765_v32  ;;  %v3738_v45 = vunpack.c.l.bf16 %v3766_v33  ;;  %v3739_v46 = vunpack.c.h.bf16 %v3766_v33  ;;  %v4728_v26 = vld [vmem:[%s5354_s1 + $0x10] sm:$0xff]   ;;  %p4481_p13 = pneg %p4480_p12 }
  0x20   : > { %277 = vst.msk [vmem:[#allocation2 + $0x51] sm:$0xff] %vm197_vm0, %v3710_v22  ;;  %278 = vst.msk [vmem:[#allocation2 + $0x59] sm:$0xff] %vm197_vm0, %v3711_v23  ;;  %v3742_v47 = vunpack.c.l.bf16 %v3767_v34  ;;  %v3743_v48 = vunpack.c.h.bf16 %v3767_v34  ;;  %v3746_v49 = vunpack.c.l.bf16 %v3768_v39  ;;  %v3747_v50 = vunpack.c.h.bf16 %v3768_v39 }
  0x21   : > { %279 = vst.msk [vmem:[#allocation2 + $0x61] sm:$0xff] %vm197_vm0, %v3714_v24  ;;  %280 = vst.msk [vmem:[#allocation2 + $0x69] sm:$0xff] %vm197_vm0, %v3715_v28  ;;  %v3750_v51 = vunpack.c.l.bf16 %v3769_v40  ;;  %v3751_v52 = vunpack.c.h.bf16 %v3769_v40  ;;  %v3754_v53 = vunpack.c.l.bf16 %v3770_v41  ;;  %v3755_v54 = vunpack.c.h.bf16 %v3770_v41  ;;  %p4488_p3 = pnand %p4487_p2, %p4481_p13 }
  0x22   : > { %281 = vst.msk [vmem:[#allocation2 + $0x71] sm:$0xff] %vm197_vm0, %v3718_v29  ;;  %282 = vst.msk [vmem:[#allocation2 + $0x79] sm:$0xff] %vm197_vm0, %v3719_v30 }
  0x23   : > { %283 = vst.msk [vmem:[#allocation2 + $0x81] sm:$0xff] %vm197_vm0, %v3722_v31  ;;  %284 = vst.msk [vmem:[#allocation2 + $0x89] sm:$0xff] %vm197_vm0, %v3723_v35  ;;  %v720_v55 = vld [vmem:[#allocation2 + $0x10] sm:$0xff]  ;;  %v721_v56 = vld [vmem:[#allocation2 + $0x18] sm:$0xff] }
  0x24   : > { %285 = vst.msk [vmem:[#allocation2 + $0x91] sm:$0xff] %vm197_vm0, %v3726_v36  ;;  %286 = vst.msk [vmem:[#allocation2 + $0x99] sm:$0xff] %vm197_vm0, %v3727_v37  ;;  %v722_v57 = vld [vmem:[#allocation2 + $0x20] sm:$0xff]  ;;  %v751_v58 = vpack.c.bf16 %v721_v56, %v720_v55  ;;  %v723_v59 = vld [vmem:[#allocation2 + $0x28] sm:$0xff] }
  0x25   : > { %287 = vst.msk [vmem:[#allocation2 + $0xa1] sm:$0xff] %vm197_vm0, %v3730_v38  ;;  %288 = vst.msk [vmem:[#allocation2 + $0xa9] sm:$0xff] %vm197_vm0, %v3731_v42  ;;  %v724_v60 = vld [vmem:[#allocation2 + $0x30] sm:$0xff]  ;;  %v725_v61 = vld [vmem:[#allocation2 + $0x38] sm:$0xff]  ;;  %v752_v62 = vpack.c.bf16 %v723_v59, %v722_v57 }
  0x26   : > { %289 = vst.msk [vmem:[#allocation2 + $0xb1] sm:$0xff] %vm197_vm0, %v3734_v43  ;;  %290 = vst.msk [vmem:[#allocation2 + $0xb9] sm:$0xff] %vm197_vm0, %v3735_v44  ;;  %v753_v63 = vpack.c.bf16 %v725_v61, %v724_v60  ;;  %3926 = vmatprep.mubr.msk.bf16.mxu1 %vm197_vm0, %v751_v58  ;;  %3961 = vmatmul.mubr.msk.bf16.vlgmr.msra.gmra.mrb[0].mxu0 %vm197_vm0, %v751_v58  ;;  %v726_v4 = vld [vmem:[#allocation2 + $0x40] sm:$0xff]  ;;  %v727_v5 = vld [vmem:[#allocation2 + $0x48] sm:$0xff] }
  0x27   : > { %291 = vst.msk [vmem:[#allocation2 + $0xc1] sm:$0xff] %vm197_vm0, %v3738_v45  ;;  %292 = vst.msk [vmem:[#allocation2 + $0xc9] sm:$0xff] %vm197_vm0, %v3739_v46  ;;  %3927 = vmatmul.mubr.msk.bf16.vlgmr.msra.gmra.mrb[0].mxu1 %vm197_vm0, %v752_v62  ;;  %3993 = vmatpush3.bf16.msra.mxu0 %v4637_v3  ;;  %v728_v6 = vld [vmem:[#allocation2 + $0x50] sm:$0xff]  ;;  %v729_v7 = vld [vmem:[#allocation2 + $0x58] sm:$0xff]  ;;  %v754_v8 = vpack.c.bf16 %v727_v5, %v726_v4 }
  0x28   : > { %293 = vst.msk [vmem:[#allocation2 + $0xd1] sm:$0xff] %vm197_vm0, %v3742_v47  ;;  %294 = vst.msk [vmem:[#allocation2 + $0xd9] sm:$0xff] %vm197_vm0, %v3743_v48  ;;  %4231 = vmatpush3.bf16.msra.mxu1 %v4626_v1  ;;  %3964 = vmatprep.mubr.msk.bf16.mxu0 %vm197_vm0, %v752_v62  ;;  %v755_v9 = vpack.c.bf16 %v729_v7, %v728_v6  ;;  %v730_v1 = vld [vmem:[#allocation2 + $0x60] sm:$0xff]  ;;  %v731_v3 = vld [vmem:[#allocation2 + $0x68] sm:$0xff] }
  0x29   : > { %295 = vst.msk [vmem:[#allocation2 + $0xe1] sm:$0xff] %vm197_vm0, %v3746_v49  ;;  %296 = vst.msk [vmem:[#allocation2 + $0xe9] sm:$0xff] %vm197_vm0, %v3747_v50  ;;  %3930 = vmatprep.mubr.msk.bf16.mxu1 %vm197_vm0, %v753_v63  ;;  %4128 = vmatprep.subr.bf16.mxu0 %v4472_v0  ;;  %v732_v10 = vld [vmem:[#allocation2 + $0x70] sm:$0xff]  ;;  %v733_v11 = vld [vmem:[#allocation2 + $0x78] sm:$0xff]  ;;  %v756_v12 = vpack.c.bf16 %v731_v3, %v730_v1 }
  0x2a   : > { %297 = vst.msk [vmem:[#allocation2 + $0xf1] sm:$0xff] %vm197_vm0, %v3750_v51  ;;  %298 = vst.msk [vmem:[#allocation2 + $0xf9] sm:$0xff] %vm197_vm0, %v3751_v52  ;;  %4026 = vmatprep.subr.bf16.mxu1 %v4705_v2  ;;  %v757_v13 = vpack.c.bf16 %v733_v11, %v732_v10  ;;  %v734_v14 = vld [vmem:[#allocation2 + $0x80] sm:$0xff]  ;;  %v735_v15 = vld [vmem:[#allocation2 + $0x88] sm:$0xff] }
  0x2b   : > { %299 = vst.msk [vmem:[#allocation2 + $0x101] sm:$0xff] %vm197_vm0, %v3754_v53  ;;  %300 = vst.msk [vmem:[#allocation2 + $0x109] sm:$0xff] %vm197_vm0, %v3755_v54  ;;  %v736_v16 = vld [vmem:[#allocation2 + $0x90] sm:$0xff]  ;;  %v737_v17 = vld [vmem:[#allocation2 + $0x98] sm:$0xff]  ;;  %v758_v18 = vpack.c.bf16 %v735_v15, %v734_v14 }
  0x2c   : > { %v759_v19 = vpack.c.bf16 %v737_v17, %v736_v16  ;;  %v738_v20 = vld [vmem:[#allocation2 + $0xa0] sm:$0xff]  ;;  %v739_v21 = vld [vmem:[#allocation2 + $0xa8] sm:$0xff]  ;;  %v1190_v44 = vld [vmem:[#allocation2 + $0x118] sm:$0xff] }
  0x2d   : > { %v740_v22 = vld [vmem:[#allocation2 + $0xb0] sm:$0xff]  ;;  %v741_v23 = vld [vmem:[#allocation2 + $0xb8] sm:$0xff]  ;;  %v760_v24 = vpack.c.bf16 %v739_v21, %v738_v20  ;;  %v4474_v42 = vld [vmem:[%s5354_s1 + $0x8] sm:$0xff]  }
  0x2e   : > { %3965 = vmatmul.mubr.msk.bf16.gmra.mrb[4].mxu0 %vm197_vm0, %v753_v63  ;;  %v761_v25 = vpack.c.bf16 %v741_v23, %v740_v22  ;;  %v742_v27 = vld [vmem:[#allocation2 + $0xc0] sm:$0xff]  ;;  %v743_v28 = vld [vmem:[#allocation2 + $0xc8] sm:$0xff]  ;;  %v2391_v45 = vld [vmem:[#allocation2 + $0x12] sm:$0xff] }
  0x2f   : > { %3931 = vmatmul.mubr.msk.bf16.gmra.mrb[4].mxu1 %vm197_vm0, %v754_v8  ;;  %3968 = vmatprep.mubr.msk.bf16.mxu0 %vm197_vm0, %v754_v8  ;;  %v744_v29 = vld [vmem:[#allocation2 + $0xd0] sm:$0xff]  ;;  %v745_v30 = vld [vmem:[#allocation2 + $0xd8] sm:$0xff]  ;;  %v762_v31 = vpack.c.bf16 %v743_v28, %v742_v27  ;;  %v2393_v52 = vld [vmem:[#allocation2 + $0x22] sm:$0xff] }
  0x30   : > { %3934 = vmatprep.mubr.msk.bf16.mxu1 %vm197_vm0, %v755_v9  ;;  %v763_v32 = vpack.c.bf16 %v745_v30, %v744_v29  ;;  %v746_v33 = vld [vmem:[#allocation2 + $0xe0] sm:$0xff]  ;;  %v747_v34 = vld [vmem:[#allocation2 + $0xe8] sm:$0xff]  ;;  %v1619_v47 = vld [vmem:[#allocation2 + $0x11] sm:$0xff] }
  0x31   : > { %v748_v35 = vld [vmem:[#allocation2 + $0xf0] sm:$0xff]  ;;  %v749_v36 = vld [vmem:[#allocation2 + $0xf8] sm:$0xff]  ;;  %v764_v37 = vpack.c.bf16 %v747_v34, %v746_v33  ;;  %v1621_v54 = vld [vmem:[#allocation2 + $0x21] sm:$0xff] }
  0x32   : > { %v765_v38 = vpack.c.bf16 %v749_v36, %v748_v35  ;;  %v768_v39 = vld [vmem:[#allocation2 + $0x100] sm:$0xff]  ;;  %v769_v40 = vld [vmem:[#allocation2 + $0x108] sm:$0xff]  ;;  %v1189_v43 = vld [vmem:[#allocation2 + $0x110] sm:$0xff] }
  0x33   : > { %v770_v41 = vpack.c.bf16 %v769_v40, %v768_v39  ;;  %v2392_v46 = vld [vmem:[#allocation2 + $0x1a] sm:$0xff]  ;;  %v1206_v49 = vpack.c.bf16 %v1190_v44, %v1189_v43  ;;  %v2394_v53 = vld [vmem:[#allocation2 + $0x2a] sm:$0xff]  ;;  %v2395_v56 = vld [vmem:[#allocation2 + $0x32] sm:$0xff] }
  0x34   : > { %v1620_v48 = vld [vmem:[#allocation2 + $0x19] sm:$0xff]  ;;  %v4763_v50 = vpack.c.bf16 %v2392_v46, %v2391_v45  ;;  %v1622_v55 = vld [vmem:[#allocation2 + $0x29] sm:$0xff]  ;;  %v4773_v58 = vpack.c.bf16 %v2394_v53, %v2393_v52  ;;  %v1623_v59 = vld [vmem:[#allocation2 + $0x31] sm:$0xff] }
  0x35   : > { %v4765_v51 = vpack.c.bf16 %v1620_v48, %v1619_v47  ;;  %v2396_v57 = vld [vmem:[#allocation2 + $0x3a] sm:$0xff]  ;;  %v4775_v61 = vpack.c.bf16 %v1622_v55, %v1621_v54  ;;  %v2397_v4 = vld [vmem:[#allocation2 + $0x42] sm:$0xff]  ;;  %v2398_v5 = vld [vmem:[#allocation2 + $0x4a] sm:$0xff] }
  0x36   : > { %3969 = vmatmul.mubr.msk.bf16.gmra.mrb[8].mxu0 %vm197_vm0, %v755_v9  ;;  %v1624_v60 = vld [vmem:[#allocation2 + $0x39] sm:$0xff]  ;;  %v1625_v6 = vld [vmem:[#allocation2 + $0x41] sm:$0xff]  ;;  %v1626_v7 = vld [vmem:[#allocation2 + $0x49] sm:$0xff]  ;;  %v4801_v10 = vpack.c.bf16 %v2398_v5, %v2397_v4 }
  0x37   : > { %3935 = vmatmul.mubr.msk.bf16.gmra.mrb[8].mxu1 %vm197_vm0, %v756_v12  ;;  %3972 = vmatprep.mubr.msk.bf16.mxu0 %vm197_vm0, %v756_v12  ;;  %v1627_v1 = vld [vmem:[#allocation2 + $0x51] sm:$0xff]  ;;  %v1628_v3 = vld [vmem:[#allocation2 + $0x59] sm:$0xff]  ;;  %v4804_v11 = vpack.c.bf16 %v1626_v7, %v1625_v6  ;;  %v2401_v14 = vld [vmem:[#allocation2 + $0x62] sm:$0xff] }
  0x38   : > { %3938 = vmatprep.mubr.msk.bf16.mxu1 %vm197_vm0, %v757_v13  ;;  %v2402_v15 = vld [vmem:[#allocation2 + $0x6a] sm:$0xff]  ;;  %v1629_v16 = vld [vmem:[#allocation2 + $0x61] sm:$0xff]  ;;  %v1632_v21 = vld [vmem:[#allocation2 + $0x79] sm:$0xff] }
  0x39   : > { %v1630_v17 = vld [vmem:[#allocation2 + $0x69] sm:$0xff]  ;;  %v1631_v20 = vld [vmem:[#allocation2 + $0x71] sm:$0xff]  ;;  %v4818_v22 = vpack.c.bf16 %v2402_v15, %v2401_v14  ;;  %v1633_v28 = vld [vmem:[#allocation2 + $0x81] sm:$0xff] }
  0x3a   : > { %v4820_v23 = vpack.c.bf16 %v1630_v17, %v1629_v16  ;;  %v2406_v27 = vld [vmem:[#allocation2 + $0x8a] sm:$0xff]  ;;  %v2407_v30 = vld [vmem:[#allocation2 + $0x92] sm:$0xff]  ;;  %v1637_v40 = vld [vmem:[#allocation2 + $0xa1] sm:$0xff] }
  0x3b   : > { %v1634_v29 = vld [vmem:[#allocation2 + $0x89] sm:$0xff]  ;;  %v1636_v33 = vld [vmem:[#allocation2 + $0x99] sm:$0xff]  ;;  %v1639_v44 = vld [vmem:[#allocation2 + $0xb1] sm:$0xff] }
  0x3c   : > { %v4836_v35 = vpack.c.bf16 %v1634_v29, %v1633_v28  ;;  %v2410_v39 = vld [vmem:[#allocation2 + $0xaa] sm:$0xff]  ;;  %v2412_v43 = vld [vmem:[#allocation2 + $0xba] sm:$0xff]  ;;  %v2413_v52 = vld [vmem:[#allocation2 + $0xc2] sm:$0xff] }
  0x3d   : > { %v1640_v45 = vld [vmem:[#allocation2 + $0xb9] sm:$0xff]  ;;  %v2414_v53 = vld [vmem:[#allocation2 + $0xca] sm:$0xff]  ;;  %v1641_v54 = vld [vmem:[#allocation2 + $0xc1] sm:$0xff] }
  0x3e   : > { %3973 = vmatmul.mubr.msk.bf16.gmra.mrb[12].mxu0 %vm197_vm0, %v757_v13  ;;  %v1642_v55 = vld [vmem:[#allocation2 + $0xc9] sm:$0xff]  ;;  %v4866_v4 = vpack.c.bf16 %v2414_v53, %v2413_v52  ;;  %v2419_v14 = vld [vmem:[#allocation2 + $0xf2] sm:$0xff]  ;;  %v2420_v15 = vld [vmem:[#allocation2 + $0xfa] sm:$0xff] }
  0x3f   : > { %3939 = vmatmul.mubr.msk.bf16.gmra.mrb[12].mxu1 %vm197_vm0, %v758_v18  ;;  %3994 = vmatprep.mubr.msk.bf16.mxu0 %vm197_vm0, %v752_v62  ;;  %v4777_v62 = vpack.c.bf16 %v2396_v57, %v2395_v56  ;;  %v2415_v56 = vld [vmem:[#allocation2 + $0xd2] sm:$0xff]  ;;  %v2416_v57 = vld [vmem:[#allocation2 + $0xda] sm:$0xff]  ;;  %v4868_v5 = vpack.c.bf16 %v1642_v55, %v1641_v54  ;;  %v1669_v29 = vld [vmem:[#allocation2 + $0x109] sm:$0xff] }
  0x40   : > { %3942 = vmatprep.mubr.msk.bf16.mxu1 %vm197_vm0, %v759_v19  ;;  %v4870_v6 = vpack.c.bf16 %v2416_v57, %v2415_v56  ;;  %v1647_v16 = vld [vmem:[#allocation2 + $0xf1] sm:$0xff]  ;;  %v1648_v17 = vld [vmem:[#allocation2 + $0xf9] sm:$0xff]  ;;  %v1668_v28 = vld [vmem:[#allocation2 + $0x101] sm:$0xff] }
  0x46   : > { %3995 = vmatmul.mubr.msk.bf16.vlgmr.msra.gmra.mrb[0].mxu0 %vm197_vm0, %v753_v63  ;;  %v4779_v63 = vpack.c.bf16 %v1624_v60, %v1623_v59  ;;  %v1643_v59 = vld [vmem:[#allocation2 + $0xd1] sm:$0xff]  ;;  %v1644_v60 = vld [vmem:[#allocation2 + $0xd9] sm:$0xff] }
  0x47   : > { %3943 = vmatmul.mubr.msk.bf16.gmra.mrb[16].mxu1 %vm197_vm0, %v760_v24  ;;  %4129 = vmatpush3.bf16.msra.mxu0 %v4472_v0  ;;  %v4784_v0 = vld [vmem:[%s5354_s1 + $0x38] sm:$0xff]   ;;  %v4872_v7 = vpack.c.bf16 %v1644_v60, %v1643_v59 }
  0x48   : > { %3998 = vmatprep.mubr.msk.bf16.mxu0 %vm197_vm0, %v754_v8  ;;  %3946 = vmatprep.mubr.msk.bf16.mxu1 %vm197_vm0, %v761_v25  ;;  %v2399_v8 = vld [vmem:[#allocation2 + $0x52] sm:$0xff] }
  0x49   : > { %4162 = vmatprep.subr.bf16.mxu0 %v4728_v26 }
  0x4e   : > { %3999 = vmatmul.mubr.msk.bf16.gmra.mrb[4].mxu0 %vm197_vm0, %v755_v9  ;;  %v2400_v9 = vld [vmem:[#allocation2 + $0x5a] sm:$0xff] }
  0x4f   : > { %3947 = vmatmul.mubr.msk.bf16.gmra.mrb[20].mxu1 %vm197_vm0, %v762_v31  ;;  %4002 = vmatprep.mubr.msk.bf16.mxu0 %vm197_vm0, %v756_v12  ;;  %v4806_v12 = vpack.c.bf16 %v2400_v9, %v2399_v8  ;;  %v2417_v8 = vld [vmem:[#allocation2 + $0xe2] sm:$0xff]  ;;  %v2418_v9 = vld [vmem:[#allocation2 + $0xea] sm:$0xff] }
  0x50   : > { %3950 = vmatprep.mubr.msk.bf16.mxu1 %vm197_vm0, %v763_v32 }
  0x56   : > { %4003 = vmatmul.mubr.msk.bf16.gmra.mrb[8].mxu0 %vm197_vm0, %v757_v13  ;;  %v4808_v13 = vpack.c.bf16 %v1628_v3, %v1627_v1  ;;  %v1645_v1 = vld [vmem:[#allocation2 + $0xe1] sm:$0xff]  ;;  %v1646_v3 = vld [vmem:[#allocation2 + $0xe9] sm:$0xff] }
  0x57   : > { %3951 = vmatmul.mubr.msk.bf16.gmra.mrb[24].mxu1 %vm197_vm0, %v764_v37  ;;  %4006 = vmatprep.mubr.msk.bf16.mxu0 %vm197_vm0, %v758_v18 }
  0x58   : > { %3954 = vmatprep.mubr.msk.bf16.mxu1 %vm197_vm0, %v765_v38 }
  0x5e   : > { %4007 = vmatmul.mubr.msk.bf16.gmra.mrb[12].mxu0 %vm197_vm0, %v759_v19 }
  0x5f   : > { %3955 = vmatmul.mubr.msk.bf16.gmra.mrb[28].mxu1 %vm197_vm0, %v770_v41  ;;  %4010 = vmatprep.mubr.msk.bf16.mxu0 %vm197_vm0, %v760_v24 }
  0x60   : > { %3976 = vmatprep.mubr.msk.bf16.mxu1 %vm197_vm0, %v758_v18  ;;  %v2403_v18 = vld [vmem:[#allocation2 + $0x72] sm:$0xff] }
  0x66   : > { %4011 = vmatmul.mubr.msk.bf16.gmra.mrb[16].mxu0 %vm197_vm0, %v761_v25 }
  0x67   : > { %3977 = vmatmul.mubr.msk.bf16.vlgmr.msra.gmra.mrb[16].mxu1 %vm197_vm0, %v759_v19  ;;  %4014 = vmatprep.mubr.msk.bf16.mxu0 %vm197_vm0, %v762_v31  ;;  %v2404_v19 = vld [vmem:[#allocation2 + $0x7a] sm:$0xff] }
  0x68   : > { %4027 = vmatpush3.bf16.msra.mxu1 %v4705_v2  ;;  %3980 = vmatprep.mubr.msk.bf16.mxu1 %vm197_vm0, %v760_v24  ;;  %v4791_v2 = vld [vmem:[%s5354_s1 + $0x40] sm:$0xff]   ;;  %v4822_v24 = vpack.c.bf16 %v2404_v19, %v2403_v18  ;;  %v4882_v18 = vpack.c.bf16 %v2418_v9, %v2417_v8  ;;  %v4884_v19 = vpack.c.bf16 %v1646_v3, %v1645_v1 }
  0x69   : > { %4060 = vmatprep.subr.bf16.mxu1 %v4474_v42 }
  0x6e   : > { %4015 = vmatmul.mubr.msk.bf16.gmra.mrb[20].mxu0 %vm197_vm0, %v763_v32 }
  0x6f   : > { %3981 = vmatmul.mubr.msk.bf16.gmra.mrb[20].mxu1 %vm197_vm0, %v761_v25  ;;  %4018 = vmatprep.mubr.msk.bf16.mxu0 %vm197_vm0, %v764_v37  ;;  %v4824_v25 = vpack.c.bf16 %v1632_v21, %v1631_v20  ;;  %v4886_v20 = vpack.c.bf16 %v2420_v15, %v2419_v14  ;;  %v4888_v21 = vpack.c.bf16 %v1648_v17, %v1647_v16 }
  0x70   : > { %3984 = vmatprep.mubr.msk.bf16.mxu1 %vm197_vm0, %v762_v31  ;;  %v2408_v31 = vld [vmem:[#allocation2 + $0x9a] sm:$0xff] }
  0x71   : > { %v4838_v36 = vpack.c.bf16 %v2408_v31, %v2407_v30  ;;  %v2389_v30 = vld [vmem:[#allocation2 + $0x2] sm:$0xff]  ;;  %v2390_v31 = vld [vmem:[#allocation2 + $0xa] sm:$0xff] }
  0x76   : > { %4019 = vmatmul.mubr.msk.bf16.gmra.mrb[24].mxu0 %vm197_vm0, %v765_v38 }
  0x77   : > { %3985 = vmatmul.mubr.msk.bf16.gmra.mrb[24].mxu1 %vm197_vm0, %v763_v32  ;;  %4022 = vmatprep.mubr.msk.bf16.mxu0 %vm197_vm0, %v770_v41  ;;  %v1635_v32 = vld [vmem:[#allocation2 + $0x91] sm:$0xff]  ;;  %v1638_v41 = vld [vmem:[#allocation2 + $0xa9] sm:$0xff] }
  0x78   : > { %3988 = vmatprep.mubr.msk.bf16.mxu1 %vm197_vm0, %v764_v37  ;;  %v4840_v37 = vpack.c.bf16 %v1636_v33, %v1635_v32  ;;  %v4852_v47 = vpack.c.bf16 %v1638_v41, %v1637_v40  ;;  %v1617_v32 = vld [vmem:[#allocation2 + $0x1] sm:$0xff]  ;;  %v1618_v33 = vld [vmem:[#allocation2 + $0x9] sm:$0xff]  ;;  %v2421_v40 = vpack.c.bf16 %v2390_v31, %v2389_v30 }
  0x79   : > { %v1649_v41 = vpack.c.bf16 %v1618_v33, %v1617_v32 }
  0x7e   : > { %4023 = vmatmul.mubr.msk.bf16.gmra.mrb[28].mxu0 %vm197_vm0, %v1206_v49  ;;  %v4856_v49 = vpack.c.bf16 %v1640_v45, %v1639_v44  ;;  %v3385_v44 = vld [vmem:[%s5356_s3] sm:$0xff] }
  0x7f   : > { %3989 = vmatmul.mubr.msk.bf16.gmra.mrb[28].mxu1 %vm197_vm0, %v765_v38  ;;  %4130 = vmatprep.mubr.msk.bf16.mxu0 %vm197_vm0, %v4763_v50  ;;  %v2409_v38 = vld [vmem:[#allocation2 + $0xa2] sm:$0xff] }
  0x80   : > { %4028 = vmatprep.mubr.msk.bf16.mxu1 %vm197_vm0, %v4765_v51  ;;  %v4850_v46 = vpack.c.bf16 %v2410_v39, %v2409_v38  ;;  %v4900_v39 = vpack.c.bf16 %v1669_v29, %v1668_v28 }
  0x86   : > { %4131 = vmatmul.mubr.msk.bf16.vlgmr.msra.gmra.mrb[32].mxu0 %vm197_vm0, %v4773_v58 }
  0x87   : > { %4029 = vmatmul.mubr.msk.bf16.vlgmr.msra.gmra.mrb[32].mxu1 %vm197_vm0, %v4775_v61  ;;  %4163 = vmatpush3.bf16.msra.mxu0 %v4728_v26  ;;  %v2405_v26 = vld [vmem:[#allocation2 + $0x82] sm:$0xff] }
  0x88   : > { %4061 = vmatpush3.bf16.msra.mxu1 %v4474_v42  ;;  %4134 = vmatprep.mubr.msk.bf16.mxu0 %vm197_vm0, %v4777_v62  ;;  %v4834_v34 = vpack.c.bf16 %v2406_v27, %v2405_v26  ;;  %v2411_v42 = vld [vmem:[#allocation2 + $0xb2] sm:$0xff]  ;;  %v2440_v26 = vld [vmem:[#allocation2 + $0x102] sm:$0xff]  ;;  %v2441_v27 = vld [vmem:[#allocation2 + $0x10a] sm:$0xff] }
  0x89   : > { %4032 = vmatprep.mubr.msk.bf16.mxu1 %vm197_vm0, %v4779_v63  ;;  %4094 = vmatprep.subr.bf16.mxu1 %v4784_v0  ;;  %v4854_v48 = vpack.c.bf16 %v2412_v43, %v2411_v42  ;;  %v4898_v38 = vpack.c.bf16 %v2441_v27, %v2440_v26  ;;  %v3355_v42 = vld [vmem:[%s5355_s2 + $0x10] sm:$0xff]  ;;  %v3356_v43 = vld [vmem:[%s5355_s2 + $0x18] sm:$0xff] }
  0x8a   : > { %4196 = vmatprep.subr.bf16.mxu0 %v4791_v2 }
  0x8e   : > { %4135 = vmatmul.mubr.msk.bf16.gmra.mrb[36].mxu0 %vm197_vm0, %v4801_v10 }
  0x8f   : > { %4033 = vmatmul.mubr.msk.bf16.gmra.mrb[36].mxu1 %vm197_vm0, %v4804_v11  ;;  %4138 = vmatprep.mubr.msk.bf16.mxu0 %vm197_vm0, %v4806_v12 }
  0x90   : > { %4036 = vmatprep.mubr.msk.bf16.mxu1 %vm197_vm0, %v4808_v13 }
  0x96   : > { %4139 = vmatmul.mubr.msk.bf16.gmra.mrb[40].mxu0 %vm197_vm0, %v4818_v22 }
  0x97   : > { %4037 = vmatmul.mubr.msk.bf16.gmra.mrb[40].mxu1 %vm197_vm0, %v4820_v23  ;;  %4142 = vmatprep.mubr.msk.bf16.mxu0 %vm197_vm0, %v4822_v24 }
  0x98   : > { %4040 = vmatprep.mubr.msk.bf16.mxu1 %vm197_vm0, %v4824_v25 }
  0x9e   : > { %4143 = vmatmul.mubr.msk.bf16.gmra.mrb[44].mxu0 %vm197_vm0, %v4834_v34 }
  0x9f   : > { %4041 = vmatmul.mubr.msk.bf16.gmra.mrb[44].mxu1 %vm197_vm0, %v4836_v35  ;;  %4146 = vmatprep.mubr.msk.bf16.mxu0 %vm197_vm0, %v4838_v36 }
  0xa0   : > { %4044 = vmatprep.mubr.msk.bf16.mxu1 %vm197_vm0, %v4840_v37 }
  0xa6   : > { %4147 = vmatmul.mubr.msk.bf16.gmra.mrb[48].mxu0 %vm197_vm0, %v4850_v46 }
  0xa7   : > { %4045 = vmatmul.mubr.msk.bf16.gmra.mrb[48].mxu1 %vm197_vm0, %v4852_v47  ;;  %4150 = vmatprep.mubr.msk.bf16.mxu0 %vm197_vm0, %v4854_v48 }
  0xa8   : > { %4048 = vmatprep.mubr.msk.bf16.mxu1 %vm197_vm0, %v4856_v49 }
  0xae   : > { %4151 = vmatmul.mubr.msk.bf16.gmra.mrb[52].mxu0 %vm197_vm0, %v4866_v4 }
  0xaf   : > { %4049 = vmatmul.mubr.msk.bf16.gmra.mrb[52].mxu1 %vm197_vm0, %v4868_v5  ;;  %4154 = vmatprep.mubr.msk.bf16.mxu0 %vm197_vm0, %v4870_v6 }
  0xb0   : > { %4052 = vmatprep.mubr.msk.bf16.mxu1 %vm197_vm0, %v4872_v7 }
  0xb6   : > { %4155 = vmatmul.mubr.msk.bf16.gmra.mrb[56].mxu0 %vm197_vm0, %v4882_v18 }
  0xb7   : > { %4053 = vmatmul.mubr.msk.bf16.gmra.mrb[56].mxu1 %vm197_vm0, %v4884_v19  ;;  %4158 = vmatprep.mubr.msk.bf16.mxu0 %vm197_vm0, %v4886_v20 }
  0xb8   : > { %4056 = vmatprep.mubr.msk.bf16.mxu1 %vm197_vm0, %v4888_v21 }
  0xbe   : > { %4159 = vmatmul.mubr.msk.bf16.gmra.mrb[60].mxu0 %vm197_vm0, %v4898_v38 }
  0xbf   : > { %4057 = vmatmul.mubr.msk.bf16.gmra.mrb[60].mxu1 %vm197_vm0, %v4900_v39  ;;  %4164 = vmatprep.mubr.msk.bf16.mxu0 %vm197_vm0, %v2421_v40  ;;  %v2090_v40 = vld [vmem:[#allocation2 + $0x119] sm:$0xff] }
  0xc0   : > { %4062 = vmatprep.mubr.msk.bf16.mxu1 %vm197_vm0, %v1649_v41 }
  0xc6   : > { %4165 = vmatmul.mubr.msk.bf16.vlgmr.msra.gmra.mrb[32].mxu0 %vm197_vm0, %v4763_v50  ;;  %v3353_v50 = vld [vmem:[%s5355_s2] sm:$0xff] }
  0xc7   : > { %4063 = vmatmul.mubr.msk.bf16.vlgmr.msra.gmra.mrb[32].mxu1 %vm197_vm0, %v4765_v51  ;;  %4197 = vmatpush3.bf16.msra.mxu0 %v4791_v2  ;;  %v3354_v51 = vld [vmem:[%s5355_s2 + $0x8] sm:$0xff] }
  0xc8   : > { %4095 = vmatpush3.bf16.msra.mxu1 %v4784_v0  ;;  %4168 = vmatprep.mubr.msk.bf16.mxu0 %vm197_vm0, %v4773_v58  ;;  %v4543_v0 = vmov 0   ;;  %v3386_v2 = vld [vmem:[%s5356_s3 + $0x8] sm:$0xff] }
  0xc9   : > { %4066 = vmatprep.mubr.msk.bf16.mxu1 %vm197_vm0, %v4775_v61  ;;  %4467 = vset.pattern.permute.xlu0 %v4543_v0 }
  0xca   : > { %4468 = vset.pattern.permute.xlu1 %v4543_v0  ;;  %3359 = vperm.xlu0 %4467, %v3353_v50  }
  0xcb   : > { %3364 = vperm.xlu1 %4468, %v3354_v51  }
  0xce   : > { %4169 = vmatmul.mubr.msk.bf16.gmra.mrb[36].mxu0 %vm197_vm0, %v4777_v62  ;;  %3396 = vperm.xlu0 %4467, %v3386_v2  }
  0xcf   : > { %4067 = vmatmul.mubr.msk.bf16.gmra.mrb[36].mxu1 %vm197_vm0, %v4779_v63  ;;  %4172 = vmatprep.mubr.msk.bf16.mxu0 %vm197_vm0, %v4801_v10 }
  0xd0   : > { %4070 = vmatprep.mubr.msk.bf16.mxu1 %vm197_vm0, %v4804_v11  ;;  %3369 = vperm.xlu1 %4468, %v3355_v42  }
  0xd4   : > { %3374 = vperm.xlu1 %4468, %v3356_v43  }
  0xd6   : > { %4173 = vmatmul.mubr.msk.bf16.gmra.mrb[40].mxu0 %vm197_vm0, %v4806_v12 }
  0xd7   : > { %4071 = vmatmul.mubr.msk.bf16.gmra.mrb[40].mxu1 %vm197_vm0, %v4808_v13  ;;  %4176 = vmatprep.mubr.msk.bf16.mxu0 %vm197_vm0, %v4818_v22 }
  0xd8   : > { %4074 = vmatprep.mubr.msk.bf16.mxu1 %vm197_vm0, %v4820_v23  ;;  %3391 = vperm.xlu1 %4468, %v3385_v44  }
  0xde   : > { %4177 = vmatmul.mubr.msk.bf16.gmra.mrb[44].mxu0 %vm197_vm0, %v4822_v24 }
  0xdf   : > { %4075 = vmatmul.mubr.msk.bf16.gmra.mrb[44].mxu1 %vm197_vm0, %v4824_v25  ;;  %4180 = vmatprep.mubr.msk.bf16.mxu0 %vm197_vm0, %v4834_v34 }
  0xe0   : > { %4078 = vmatprep.mubr.msk.bf16.mxu1 %vm197_vm0, %v4836_v35 }
  0xe6   : > { %4181 = vmatmul.mubr.msk.bf16.gmra.mrb[48].mxu0 %vm197_vm0, %v4838_v36 }
  0xe7   : > { %4079 = vmatmul.mubr.msk.bf16.gmra.mrb[48].mxu1 %vm197_vm0, %v4840_v37  ;;  %4184 = vmatprep.mubr.msk.bf16.mxu0 %vm197_vm0, %v4850_v46 }
  0xe8   : > { %4082 = vmatprep.mubr.msk.bf16.mxu1 %vm197_vm0, %v4852_v47 }
  0xee   : > { %4185 = vmatmul.mubr.msk.bf16.gmra.mrb[52].mxu0 %vm197_vm0, %v4854_v48 }
  0xef   : > { %4083 = vmatmul.mubr.msk.bf16.gmra.mrb[52].mxu1 %vm197_vm0, %v4856_v49  ;;  %4188 = vmatprep.mubr.msk.bf16.mxu0 %vm197_vm0, %v4866_v4 }
  0xf0   : > { %4086 = vmatprep.mubr.msk.bf16.mxu1 %vm197_vm0, %v4868_v5 }
  0xf6   : > { %4189 = vmatmul.mubr.msk.bf16.gmra.mrb[56].mxu0 %vm197_vm0, %v4870_v6 }
  0xf7   : > { %4087 = vmatmul.mubr.msk.bf16.gmra.mrb[56].mxu1 %vm197_vm0, %v4872_v7  ;;  %4192 = vmatprep.mubr.msk.bf16.mxu0 %vm197_vm0, %v4882_v18 }
  0xf8   : > { %4090 = vmatprep.mubr.msk.bf16.mxu1 %vm197_vm0, %v4884_v19 }
  0xfa   : > { %v3928_v45 = vpop.f32.mrb[0].mxu1 }
  0xfb   : > { %v862_v52 = vpop.f32.mrb[1].mxu1 }
  0xfc   : > { %v3929_v53 = vpop.f32.mrb[2].mxu1 }
  0xfd   : > { %v865_v54 = vpop.f32.mrb[3].mxu1 }
  0xfe   : > { %4193 = vmatmul.mubr.msk.bf16.gmra.mrb[60].mxu0 %vm197_vm0, %v4886_v20 }
  0xff   : > { %4091 = vmatmul.mubr.msk.bf16.gmra.mrb[60].mxu1 %vm197_vm0, %v4888_v21  ;;  %4198 = vmatprep.mubr.msk.bf16.mxu0 %vm197_vm0, %v4773_v58 }
 0x100   : > { %4096 = vmatprep.mubr.msk.bf16.mxu1 %vm197_vm0, %v4775_v61 }
 0x102   : > { %v3932_v55 = vpop.f32.mrb[4].mxu1 }
 0x103   : > { %v878_v56 = vpop.f32.mrb[5].mxu1 }
 0x104   : > { %v3933_v57 = vpop.f32.mrb[6].mxu1 }
 0x105   : > { %v881_v59 = vpop.f32.mrb[7].mxu1 }
 0x106   : > { %4199 = vmatmul.mubr.msk.bf16.vlgmr.msra.gmra.mrb[32].mxu0 %vm197_vm0, %v4777_v62 }
 0x107   : > { %4097 = vmatmul.mubr.msk.bf16.vlgmr.msra.gmra.mrb[32].mxu1 %vm197_vm0, %v4779_v63  ;;  %4202 = vmatprep.mubr.msk.bf16.mxu0 %vm197_vm0, %v4801_v10 }
 0x108   : > { %4100 = vmatprep.mubr.msk.bf16.mxu1 %vm197_vm0, %v4804_v11 }
 0x10a   : > { %v3936_v58 = vpop.f32.mrb[8].mxu1 }
 0x10b   : > { %v894_v60 = vpop.f32.mrb[9].mxu1 }
 0x10c   : > { %v3937_v8 = vpop.f32.mrb[10].mxu1 }
 0x10d   : > { %v897_v61 = vpop.f32.mrb[11].mxu1 }
 0x10e   : > { %4203 = vmatmul.mubr.msk.bf16.gmra.mrb[36].mxu0 %vm197_vm0, %v4806_v12 }
 0x10f   : > { %4101 = vmatmul.mubr.msk.bf16.gmra.mrb[36].mxu1 %vm197_vm0, %v4808_v13  ;;  %4206 = vmatprep.mubr.msk.bf16.mxu0 %vm197_vm0, %v4818_v22 }
 0x110   : > { %4104 = vmatprep.mubr.msk.bf16.mxu1 %vm197_vm0, %v4820_v23 }
 0x112   : > { %v3940_v62 = vpop.f32.mrb[12].mxu1 }
 0x113   : > { %v910_v63 = vpop.f32.mrb[13].mxu1 }
 0x114   : > { %v3941_v10 = vpop.f32.mrb[14].mxu1 }
 0x115   : > { %v913_v11 = vpop.f32.mrb[15].mxu1 }
 0x116   : > { %4207 = vmatmul.mubr.msk.bf16.gmra.mrb[40].mxu0 %vm197_vm0, %v4822_v24 }
 0x117   : > { %4105 = vmatmul.mubr.msk.bf16.gmra.mrb[40].mxu1 %vm197_vm0, %v4824_v25  ;;  %4210 = vmatprep.mubr.msk.bf16.mxu0 %vm197_vm0, %v4834_v34 }
 0x118   : > { %4108 = vmatprep.mubr.msk.bf16.mxu1 %vm197_vm0, %v4836_v35 }
 0x119   : > { %v3996_v12 = vpop.f32.mrb[0].mxu0 }
 0x11a   : > { %v5016_v13 = vadd.f32 %v3996_v12, %v3928_v45  ;;  %v1298_v22 = vpop.f32.mrb[1].mxu0 }
 0x11b   : > { %v5018_v23 = vadd.f32 %v1298_v22, %v862_v52  ;;  %v3997_v9 = vpop.f32.mrb[2].mxu0 }
 0x11c   : > { %v5020_v1 = vadd.f32 %v3997_v9, %v3929_v53  ;;  %v1301_v3 = vpop.f32.mrb[3].mxu0 }
 0x11d   : > { %v5022_v24 = vadd.f32 %v1301_v3, %v865_v54 }
 0x11e   : > { %4211 = vmatmul.mubr.msk.bf16.gmra.mrb[44].mxu0 %vm197_vm0, %v4838_v36 }
 0x11f   : > { %4109 = vmatmul.mubr.msk.bf16.gmra.mrb[44].mxu1 %vm197_vm0, %v4840_v37  ;;  %4214 = vmatprep.mubr.msk.bf16.mxu0 %vm197_vm0, %v4850_v46 }
 0x120   : > { %4112 = vmatprep.mubr.msk.bf16.mxu1 %vm197_vm0, %v4852_v47 }
 0x121   : > { %v4000_v25 = vpop.f32.mrb[4].mxu0 }
 0x122   : > { %v5032_v34 = vadd.f32 %v4000_v25, %v3932_v55  ;;  %v1314_v35 = vpop.f32.mrb[5].mxu0 }
 0x123   : > { %v5034_v14 = vadd.f32 %v1314_v35, %v878_v56  ;;  %v4001_v15 = vpop.f32.mrb[6].mxu0 }
 0x124   : > { %v5036_v16 = vadd.f32 %v4001_v15, %v3933_v57  ;;  %v1317_v17 = vpop.f32.mrb[7].mxu0 }
 0x125   : > { %v5038_v36 = vadd.f32 %v1317_v17, %v881_v59 }
 0x126   : > { %4215 = vmatmul.mubr.msk.bf16.gmra.mrb[48].mxu0 %vm197_vm0, %v4854_v48 }
 0x127   : > { %4113 = vmatmul.mubr.msk.bf16.gmra.mrb[48].mxu1 %vm197_vm0, %v4856_v49  ;;  %4218 = vmatprep.mubr.msk.bf16.mxu0 %vm197_vm0, %v4866_v4 }
 0x128   : > { %4116 = vmatprep.mubr.msk.bf16.mxu1 %vm197_vm0, %v4868_v5 }
 0x129   : > { %v4004_v37 = vpop.f32.mrb[8].mxu0 }
 0x12a   : > { %v5048_v46 = vadd.f32 %v4004_v37, %v3936_v58  ;;  %v1330_v47 = vpop.f32.mrb[9].mxu0 }
 0x12b   : > { %v5050_v26 = vadd.f32 %v1330_v47, %v894_v60  ;;  %v4005_v27 = vpop.f32.mrb[10].mxu0 }
 0x12c   : > { %v5052_v28 = vadd.f32 %v4005_v27, %v3937_v8  ;;  %v1333_v29 = vpop.f32.mrb[11].mxu0 }
 0x12d   : > { %v5054_v48 = vadd.f32 %v1333_v29, %v897_v61 }
 0x12e   : > { %4219 = vmatmul.mubr.msk.bf16.gmra.mrb[52].mxu0 %vm197_vm0, %v4870_v6 }
 0x12f   : > { %4117 = vmatmul.mubr.msk.bf16.gmra.mrb[52].mxu1 %vm197_vm0, %v4872_v7  ;;  %4222 = vmatprep.mubr.msk.bf16.mxu0 %vm197_vm0, %v4882_v18  ;;  %v2861_v7 = vld [vmem:[#allocation2 + $0x112] sm:$0xff]  ;;  %v2862_v18 = vld [vmem:[#allocation2 + $0x11a] sm:$0xff] }
 0x130   : > { %4120 = vmatprep.mubr.msk.bf16.mxu1 %vm197_vm0, %v4884_v19  ;;  %v2089_v19 = vld [vmem:[#allocation2 + $0x111] sm:$0xff]  ;;  %v2878_v0 = vpack.c.bf16 %v2862_v18, %v2861_v7 }
 0x131   : > { %v4008_v49 = vpop.f32.mrb[12].mxu0  ;;  %v2106_v43 = vpack.c.bf16 %v2090_v40, %v2089_v19 }
 0x132   : > { %v5064_v4 = vadd.f32 %v4008_v49, %v3940_v62  ;;  %v1346_v5 = vpop.f32.mrb[13].mxu0 }
 0x133   : > { %v5066_v30 = vadd.f32 %v1346_v5, %v910_v63  ;;  %v4009_v31 = vpop.f32.mrb[14].mxu0 }
 0x134   : > { %v5068_v32 = vadd.f32 %v4009_v31, %v3941_v10  ;;  %v1349_v33 = vpop.f32.mrb[15].mxu0 }
 0x135   : > { %v5070_v6 = vadd.f32 %v1349_v33, %v913_v11 }
 0x136   : > { %4223 = vmatmul.mubr.msk.bf16.gmra.mrb[56].mxu0 %vm197_vm0, %v4886_v20 }
 0x137   : > { %4121 = vmatmul.mubr.msk.bf16.gmra.mrb[56].mxu1 %vm197_vm0, %v4888_v21  ;;  %4226 = vmatprep.mubr.msk.bf16.mxu0 %vm197_vm0, %v4898_v38 }
 0x138   : > { %4124 = vmatprep.mubr.msk.bf16.mxu1 %vm197_vm0, %v4900_v39 }
 0x139   : > { %v4012_v41 = vpop.f32.mrb[16].mxu0 }
 0x13a   : > { %v3978_v50 = vpop.f32.mrb[16].mxu1  ;;  %v1362_v51 = vpop.f32.mrb[17].mxu0 }
 0x13b   : > { %v5080_v2 = vadd.f32 %v4012_v41, %v3978_v50  ;;  %v1096_v20 = vpop.f32.mrb[17].mxu1  ;;  %v4013_v42 = vpop.f32.mrb[18].mxu0 }
 0x13c   : > { %v5082_v21 = vadd.f32 %v1362_v51, %v1096_v20  ;;  %v3979_v44 = vpop.f32.mrb[18].mxu1  ;;  %v1365_v38 = vpop.f32.mrb[19].mxu0  ;;  %v301_v51 = vlaneseq }
 0x13d   : > { %v5084_v45 = vadd.f32 %v4013_v42, %v3979_v44  ;;  %v1099_v52 = vpop.f32.mrb[19].mxu1 }
 0x13e   : > { %v5086_v53 = vadd.f32 %v1365_v38, %v1099_v52  ;;  %4227 = vmatmul.mubr.msk.bf16.gmra.mrb[60].mxu0 %vm197_vm0, %v2878_v0  ;;  %v5114_v0 = vshrl.u32 %v301_v51, 7 }
 0x13f   : > { %4125 = vmatmul.mubr.msk.bf16.gmra.mrb[60].mxu1 %vm197_vm0, %v2106_v43 }
 0x140   : > { %v304_v20 = vadd.s32 16, %v5114_v0  ;;  %v305_v43 = vadd.s32 24, %v5114_v0  ;;  %v338_v44 = vand.u32 15, %v5114_v0  ;;  %v303_v38 = vadd.s32 8, %v5114_v0 }
 0x141   : > { %v4016_v39 = vpop.f32.mrb[20].mxu0  ;;  %v308_v52 = vadd.s32 48, %v5114_v0 }
 0x142   : > { %v3982_v54 = vpop.f32.mrb[20].mxu1  ;;  %v1378_v55 = vpop.f32.mrb[21].mxu0  ;;  %v352_v42 = vand.u32 15, %v304_v20  ;;  %vm1457_vm3 = vcmp.ge.s32.totalorder %v338_v44, 1  ;;  %v310_v44 = vadd.s32 64, %v5114_v0 }
 0x143   : > { %v5090_v56 = vadd.f32 %v4016_v39, %v3982_v54  ;;  %v1112_v57 = vpop.f32.mrb[21].mxu1  ;;  %v4017_v59 = vpop.f32.mrb[22].mxu0  ;;  %v359_v39 = vand.u32 15, %v305_v43  ;;  %v345_v54 = vand.u32 15, %v303_v38 }
 0x144   : > { %v5092_v58 = vadd.f32 %v1378_v55, %v1112_v57  ;;  %v3983_v60 = vpop.f32.mrb[22].mxu1  ;;  %v1381_v8 = vpop.f32.mrb[23].mxu0  ;;  %vm1459_vm2 = vcmp.ge.s32.totalorder %v352_v42, 1  ;;  %v306_v55 = vadd.s32 32, %v5114_v0 }
 0x145   : > { %v5094_v61 = vadd.f32 %v4017_v59, %v3983_v60  ;;  %v1115_v62 = vpop.f32.mrb[23].mxu1  ;;  %v1555_v59 = vsel %vm1459_vm2, %v5016_v13, 0.0  ;;  %vm3132_vm4 = vcmp.lt.s32.totalorder %v359_v39, 15  ;;  %vm3130_vm5 = vcmp.lt.s32.totalorder %v345_v54, 15 }
 0x146   : > { %v5096_v63 = vadd.f32 %v1381_v8, %v1115_v62  ;;  %v380_v62 = vand.u32 15, %v308_v52 }
 0x148   : > { %vm1463_vm6 = vcmp.ge.s32.totalorder %v380_v62, 1 }
 0x149   : > { %v4020_v10 = vpop.f32.mrb[24].mxu0 }
 0x14a   : > { %v3986_v11 = vpop.f32.mrb[24].mxu1  ;;  %v1394_v12 = vpop.f32.mrb[25].mxu0 }
 0x14b   : > { %v5098_v22 = vadd.f32 %v4020_v10, %v3986_v11  ;;  %v1128_v9 = vpop.f32.mrb[25].mxu1  ;;  %v4021_v3 = vpop.f32.mrb[26].mxu0  ;;  %v1553_v11 = vsel %vm1457_vm3, %v5018_v23, 0.0 }
 0x14c   : > { %v5100_v25 = vadd.f32 %v1394_v12, %v1128_v9  ;;  %v3987_v35 = vpop.f32.mrb[26].mxu1  ;;  %v1397_v15 = vpop.f32.mrb[27].mxu0 }
 0x14d   : > { %v5102_v17 = vadd.f32 %v4021_v3, %v3987_v35  ;;  %v1131_v37 = vpop.f32.mrb[27].mxu1  ;;  %v309_v3 = vadd.s32 56, %v5114_v0 }
 0x14e   : > { %v5104_v47 = vadd.f32 %v1397_v15, %v1131_v37 }
 0x14f   : > { %v387_v20 = vand.u32 15, %v309_v3 }
 0x151   : > { %v4024_v27 = vpop.f32.mrb[28].mxu0  ;;  %vm5132_vm8 = vcmp.lt.s32.totalorder %v387_v20, 15 }
 0x152   : > { %v3990_v29 = vpop.f32.mrb[28].mxu1  ;;  %v1410_v49 = vpop.f32.mrb[29].mxu0 }
 0x153   : > { %v5106_v5 = vadd.f32 %v4024_v27, %v3990_v29  ;;  %v1144_v31 = vpop.f32.mrb[29].mxu1  ;;  %v4025_v33 = vpop.f32.mrb[30].mxu0  ;;  %v366_v27 = vand.u32 15, %v306_v55  ;;  %v307_v29 = vadd.s32 40, %v5114_v0 }
 0x154   : > { %v5108_v7 = vadd.f32 %v1410_v49, %v1144_v31  ;;  %v3991_v18 = vpop.f32.mrb[30].mxu1  ;;  %v1413_v19 = vpop.f32.mrb[31].mxu0 }
 0x155   : > { %v5110_v40 = vadd.f32 %v4025_v33, %v3991_v18  ;;  %v1147_v41 = vpop.f32.mrb[31].mxu1  ;;  %vm1461_vm7 = vcmp.ge.s32.totalorder %v366_v27, 1  ;;  %v373_v43 = vand.u32 15, %v307_v29  ;;  %v316_v29 = vadd.s32 112, %v5114_v0 }
 0x156   : > { %v5112_v50 = vadd.f32 %v1413_v19, %v1147_v41  ;;  %v312_v19 = vadd.s32 80, %v5114_v0 }
 0x157   : > { %vm5137_vm9 = vcmp.lt.s32.totalorder %v373_v43, 15 }
 0x158   : > { %v408_v54 = vand.u32 15, %v312_v19 }
 0x15a   : > { %vm1467_vm10 = vcmp.ge.s32.totalorder %v408_v54, 1 }
 0x1d9   : > { %v4200_v57 = vpop.f32.mrb[32].mxu0 }
 0x1da   : > { %v4098_v60 = vpop.f32.mrb[32].mxu1  ;;  %v2970_v8 = vpop.f32.mrb[33].mxu0 }
 0x1db   : > { %v2359_v10 = vadd.f32 %v4098_v60, %v1555_v59  ;;  %v2198_v12 = vpop.f32.mrb[33].mxu1  ;;  %v4201_v9 = vpop.f32.mrb[34].mxu0 }
 0x1dc   : > { %v2357_v35 = vadd.f32 %v2198_v12, %v1553_v11  ;;  %v4099_v15 = vpop.f32.mrb[34].mxu1  ;;  %v2973_v37 = vpop.f32.mrb[35].mxu0  ;;  %v3228_v18 = vsel %vm3132_vm4, %v4201_v9, 0.0  ;;  %v394_v12 = vand.u32 15, %v310_v44  ;;  %v311_v9 = vadd.s32 72, %v5114_v0 }
 0x1dd   : > { %v3259_v49 = vadd.f32 %v4200_v57, %v2359_v10  ;;  %v2360_v13 = vadd.f32 %v5020_v1, %v4099_v15  ;;  %v2201_v31 = vpop.f32.mrb[35].mxu1  ;;  %v3226_v51 = vsel %vm3130_vm5, %v2973_v37, 0.0  ;;  %v1559_v1 = vsel %vm1463_vm6, %v5032_v34, 0.0 }
 0x1de   : > { %v3257_v33 = vadd.f32 %v2970_v8, %v2357_v35  ;;  %v2358_v23 = vadd.f32 %v5022_v24, %v2201_v31  ;;  %v1557_v24 = vsel %vm1461_vm7, %v5034_v14, 0.0  ;;  %v313_v8 = vadd.s32 88, %v5114_v0 }
 0x1df   : > { %v3260_v41 = vadd.f32 %v3228_v18, %v2360_v13  ;;  %vm1465_vm11 = vcmp.ge.s32.totalorder %v394_v12, 1  ;;  %v320_v11 = vadd.s32 144, %v5114_v0 }
 0x1e0   : > { %v3258_v42 = vadd.f32 %v3226_v51, %v2358_v23  ;;  %3289 = vxpose.xlu0.b32.start [1/16] (narrow) %v3257_v33, 32  ;;  %v415_v33 = vand.u32 15, %v313_v8  ;;  %v314_v23 = vadd.s32 96, %v5114_v0  ;;  %v1563_v51 = vsel %vm1467_vm10, %v5048_v46, 0.0 }
 0x1e1   : > { %v4204_v38 = vpop.f32.mrb[36].mxu0  ;;  %v1561_v44 = vsel %vm1465_vm11, %v5050_v26, 0.0 }
 0x1e2   : > { %v4102_v52 = vpop.f32.mrb[36].mxu1  ;;  %v2986_v39 = vpop.f32.mrb[37].mxu0  ;;  %vm5156_vm12 = vcmp.lt.s32.totalorder %v415_v33, 15 }
 0x1e3   : > { %v2363_v55 = vadd.f32 %v4102_v52, %v1559_v1  ;;  %v2214_v57 = vpop.f32.mrb[37].mxu1  ;;  %v4205_v59 = vpop.f32.mrb[38].mxu0 }
 0x1e4   : > { %v2361_v62 = vadd.f32 %v2214_v57, %v1557_v24  ;;  %v2989_v10 = vpop.f32.mrb[39].mxu0  ;;  %3290 = vxpose.xlu0.b32.cont [2/16] (narrow) %v3258_v42, 32  ;;  %v4103_v34 = vpop.f32.mrb[38].mxu1  ;;  %v3232_v37 = vsel %vm5132_vm8, %v4205_v59, 0.0  ;;  %v436_v42 = vand.u32 15, %v316_v29  ;;  %v422_v24 = vand.u32 15, %v314_v23 }
 0x1e5   : > { %v5142_v14 = vadd.f32 %v4204_v38, %v2363_v55  ;;  %v2364_v3 = vadd.f32 %v5036_v16, %v4103_v34  ;;  %v2217_v35 = vpop.f32.mrb[39].mxu1  ;;  %v3230_v13 = vsel %vm5137_vm9, %v2989_v10, 0.0  ;;  %v401_v16 = vand.u32 15, %v311_v9 }
 0x1e6   : > { %v3261_v15 = vadd.f32 %v2986_v39, %v2361_v62  ;;  %v2362_v27 = vadd.f32 %v5038_v36, %v2217_v35  ;;  %v315_v57 = vadd.s32 104, %v5114_v0  ;;  %vm1471_vm14 = vcmp.ge.s32.totalorder %v436_v42, 1 }
 0x1e7   : > { %v5151_v31 = vadd.f32 %v3232_v37, %v2364_v3  ;;  %vm5161_vm13 = vcmp.lt.s32.totalorder %v401_v16, 15  ;;  %vm1469_vm15 = vcmp.ge.s32.totalorder %v422_v24, 1  ;;  %v318_v3 = vadd.s32 128, %v5114_v0 }
 0x1e8   : > { %v3262_v18 = vadd.f32 %v3230_v13, %v2362_v27  ;;  %3291 = vxpose.xlu0.b32.cont [3/16] (narrow) %v3259_v49, 32  ;;  %v317_v49 = vadd.s32 120, %v5114_v0  ;;  %v1567_v37 = vsel %vm1471_vm14, %v5064_v4, 0.0  ;;  %v464_v29 = vand.u32 15, %v320_v11 }
 0x1e9   : > { %v4208_v19 = vpop.f32.mrb[40].mxu0  ;;  %v1565_v33 = vsel %vm1469_vm15, %v5066_v30, 0.0  ;;  %v450_v42 = vand.u32 15, %v318_v3  ;;  %v322_v24 = vadd.s32 160, %v5114_v0 }
 0x1ea   : > { %v4106_v20 = vpop.f32.mrb[40].mxu1  ;;  %v3002_v36 = vpop.f32.mrb[41].mxu0  ;;  %v443_v12 = vand.u32 15, %v317_v49  ;;  %vm1475_vm2 = vcmp.ge.s32.totalorder %v464_v29, 1 }
 0x1eb   : > { %v2367_v43 = vadd.f32 %v4106_v20, %v1563_v51  ;;  %v2230_v38 = vpop.f32.mrb[41].mxu1  ;;  %v4209_v1 = vpop.f32.mrb[42].mxu0  ;;  %vm1473_vm3 = vcmp.ge.s32.totalorder %v450_v42, 1 }
 0x1ec   : > { %v2365_v39 = vadd.f32 %v2230_v38, %v1561_v44  ;;  %v3005_v54 = vpop.f32.mrb[43].mxu0  ;;  %3292 = vxpose.xlu0.b32.cont [4/16] (narrow) %v3260_v41, 32  ;;  %v4107_v46 = vpop.f32.mrb[42].mxu1  ;;  %v3236_v62 = vsel %vm5156_vm12, %v4209_v1, 0.0  ;;  %vm5184_vm0 = vcmp.lt.s32.totalorder %v443_v12, 15  ;;  %v1569_v11 = vsel %vm1473_vm3, %v5082_v21, 0.0 }
 0x1ed   : > { %v5166_v26 = vadd.f32 %v4208_v19, %v2367_v43  ;;  %v2368_v59 = vadd.f32 %v5052_v28, %v4107_v46  ;;  %v2233_v60 = vpop.f32.mrb[43].mxu1  ;;  %v3234_v41 = vsel %vm5161_vm13, %v3005_v54, 0.0  ;;  %v429_v28 = vand.u32 15, %v315_v57 }
 0x1ee   : > { %v5169_v8 = vadd.f32 %v3002_v36, %v2365_v39  ;;  %v2366_v10 = vadd.f32 %v5054_v48, %v2233_v60  ;;  %v319_v43 = vadd.s32 136, %v5114_v0  ;;  %v324_v39 = vadd.s32 176, %v5114_v0 }
 0x1ef   : > { %v5177_v34 = vadd.f32 %v3236_v62, %v2368_v59  ;;  %vm5189_vm1 = vcmp.lt.s32.totalorder %v429_v28, 15  ;;  %v323_v21 = vadd.s32 168, %v5114_v0 }
 0x1f0   : > { %v5179_v9 = vadd.f32 %v3234_v41, %v2366_v10  ;;  %3293 = vxpose.xlu0.b32.cont [5/16] (narrow) %v3261_v15, 32  ;;  %v321_v15 = vadd.s32 152, %v5114_v0  ;;  %v492_v62 = vand.u32 15, %v324_v39 }
 0x1f1   : > { %v4212_v35 = vpop.f32.mrb[44].mxu0 }
 0x1f2   : > { %v4110_v48 = vpop.f32.mrb[44].mxu1  ;;  %v3018_v27 = vpop.f32.mrb[45].mxu0  ;;  %v471_v55 = vand.u32 15, %v321_v15  ;;  %v326_v15 = vadd.s32 192, %v5114_v0  ;;  %vm1479_vm6 = vcmp.ge.s32.totalorder %v492_v62, 1  ;;  %v332_v62 = vadd.s32 240, %v5114_v0 }
 0x1f3   : > { %v2371_v13 = vadd.f32 %v4110_v48, %v1567_v37  ;;  %v2246_v16 = vpop.f32.mrb[45].mxu1  ;;  %v4213_v23 = vpop.f32.mrb[46].mxu0  ;;  %v478_v48 = vand.u32 15, %v322_v24  ;;  %v1575_v42 = vsel %vm1479_vm6, %v5090_v56, 0.0 }
 0x1f4   : > { %v2369_v51 = vadd.f32 %v2246_v16, %v1565_v33  ;;  %v3021_v20 = vpop.f32.mrb[47].mxu0  ;;  %3294 = vxpose.xlu0.b32.cont [6/16] (narrow) %v3262_v18, 32  ;;  %v4111_v4 = vpop.f32.mrb[46].mxu1  ;;  %v3240_v52 = vsel %vm5184_vm0, %v4213_v23, 0.0  ;;  %vm5213_vm4 = vcmp.lt.s32.totalorder %v471_v55, 15  ;;  %v328_v33 = vadd.s32 208, %v5114_v0 }
 0x1f5   : > { %v5194_v30 = vadd.f32 %v4212_v35, %v2371_v13  ;;  %v2372_v44 = vadd.f32 %v5068_v32, %v4111_v4  ;;  %v2249_v38 = vpop.f32.mrb[47].mxu1  ;;  %v3238_v18 = vsel %vm5189_vm1, %v3021_v20, 0.0  ;;  %v457_v32 = vand.u32 15, %v319_v43 }
 0x1f6   : > { %v5197_v1 = vadd.f32 %v3018_v27, %v2369_v51  ;;  %v2370_v49 = vadd.f32 %v5070_v6, %v2249_v38  ;;  %v1571_v6 = vsel %vm1475_vm2, %v5080_v2, 0.0  ;;  %vm1477_vm7 = vcmp.ge.s32.totalorder %v478_v48, 1 }
 0x1f7   : > { %v5205_v54 = vadd.f32 %v3240_v52, %v2372_v44  ;;  %vm5218_vm5 = vcmp.lt.s32.totalorder %v457_v32, 15  ;;  %v506_v38 = vand.u32 15, %v326_v15  ;;  %v548_v48 = vand.u32 15, %v332_v62 }
 0x1f8   : > { %v5207_v46 = vadd.f32 %v3238_v18, %v2370_v49  ;;  %3295 = vxpose.xlu0.b32.cont [7/16] (narrow) %v5142_v14, 32  ;;  %v325_v14 = vadd.s32 184, %v5114_v0  ;;  %v1573_v49 = vsel %vm1477_vm7, %v5092_v58, 0.0  ;;  %v327_v58 = vadd.s32 200, %v5114_v0 }
 0x1f9   : > { %v4216_v57 = vpop.f32.mrb[48].mxu0  ;;  %vm1481_vm11 = vcmp.ge.s32.totalorder %v506_v38, 1  ;;  %v331_v15 = vadd.s32 232, %v5114_v0  ;;  %vm1487_vm14 = vcmp.ge.s32.totalorder %v548_v48, 1 }
 0x1fa   : > { %v4114_v59 = vpop.f32.mrb[48].mxu1  ;;  %v3034_v60 = vpop.f32.mrb[49].mxu0  ;;  %v499_v20 = vand.u32 15, %v325_v14 }
 0x1fb   : > { %v2375_v10 = vadd.f32 %v4114_v59, %v1571_v6  ;;  %v2262_v41 = vpop.f32.mrb[49].mxu1  ;;  %v4217_v12 = vpop.f32.mrb[50].mxu0 }
 0x1fc   : > { %v2373_v3 = vadd.f32 %v2262_v41, %v1569_v11  ;;  %v3037_v35 = vpop.f32.mrb[51].mxu0  ;;  %3296 = vxpose.xlu0.b32.cont [8/16] (narrow) %v5151_v31, 32  ;;  %v4115_v2 = vpop.f32.mrb[50].mxu1  ;;  %v3244_v23 = vsel %vm5213_vm4, %v4217_v12, 0.0  ;;  %vm5235_vm8 = vcmp.lt.s32.totalorder %v499_v20, 15  ;;  %v330_v12 = vadd.s32 224, %v5114_v0 }
 0x1fd   : > { %v3275_v27 = vadd.f32 %v4216_v57, %v2375_v10  ;;  %v2376_v29 = vadd.f32 %v5084_v45, %v4115_v2  ;;  %v2265_v13 = vpop.f32.mrb[51].mxu1  ;;  %v3242_v31 = vsel %vm5218_vm5, %v3037_v35, 0.0  ;;  %v485_v45 = vand.u32 15, %v323_v21 }
 0x1fe   : > { %v3273_v16 = vadd.f32 %v3034_v60, %v2373_v3  ;;  %v2374_v19 = vadd.f32 %v5086_v53, %v2265_v13  ;;  %v520_v53 = vand.u32 15, %v328_v33  ;;  %v534_v21 = vand.u32 15, %v330_v12 }
 0x1ff   : > { %v3276_v51 = vadd.f32 %v3244_v23, %v2376_v29  ;;  %vm5240_vm9 = vcmp.lt.s32.totalorder %v485_v45, 15  ;;  %v1577_v13 = vsel %vm1481_vm11, %v5100_v25, 0.0 }
 0x200   : > { %v3274_v36 = vadd.f32 %v3242_v31, %v2374_v19  ;;  %3297 = vxpose.xlu0.b32.cont [9/16] (narrow) %v5169_v8, 32  ;;  %3321 = vxpose.xlu1.b32.start [1/16] (narrow) %v3273_v16, 32  ;;  %v329_v8 = vadd.s32 216, %v5114_v0  ;;  %vm1483_vm10 = vcmp.ge.s32.totalorder %v520_v53, 1  ;;  %vm1485_vm15 = vcmp.ge.s32.totalorder %v534_v21, 1 }
 0x201   : > { %v4220_v4 = vpop.f32.mrb[52].mxu0  ;;  %v1579_v37 = vsel %vm1483_vm10, %v5098_v22, 0.0 }
 0x202   : > { %v4118_v43 = vpop.f32.mrb[52].mxu1  ;;  %v3050_v44 = vpop.f32.mrb[53].mxu0  ;;  %v527_v14 = vand.u32 15, %v329_v8 }
 0x203   : > { %v2379_v52 = vadd.f32 %v4118_v43, %v1575_v42  ;;  %v2278_v39 = vpop.f32.mrb[53].mxu1  ;;  %v4221_v18 = vpop.f32.mrb[54].mxu0 }
 0x204   : > { %v2377_v32 = vadd.f32 %v2278_v39, %v1573_v49  ;;  %v3053_v24 = vpop.f32.mrb[55].mxu0  ;;  %3298 = vxpose.xlu0.b32.cont [10/16] (narrow) %v5179_v9, 32  ;;  %3322 = vxpose.xlu1.b32.cont [2/16] (narrow) %v3274_v36, 32  ;;  %v4119_v56 = vpop.f32.mrb[54].mxu1  ;;  %v3248_v11 = vsel %vm5235_vm8, %v4221_v18, 0.0  ;;  %vm5261_vm12 = vcmp.lt.s32.totalorder %v527_v14, 15 }
 0x205   : > { %v5246_v6 = vadd.f32 %v4220_v4, %v2379_v52  ;;  %v2380_v59 = vadd.f32 %v5094_v61, %v4119_v56  ;;  %v2281_v60 = vpop.f32.mrb[55].mxu1  ;;  %v3246_v9 = vsel %vm5240_vm9, %v3053_v24, 0.0  ;;  %v513_v61 = vand.u32 15, %v327_v58 }
 0x206   : > { %v3277_v10 = vadd.f32 %v3050_v44, %v2377_v32  ;;  %v2378_v41 = vadd.f32 %v5096_v63, %v2281_v60  ;;  %v1581_v49 = vsel %vm1485_vm15, %v5108_v7, 0.0 }
 0x207   : > { %v5256_v28 = vadd.f32 %v3248_v11, %v2380_v59  ;;  %vm3154_vm13 = vcmp.lt.s32.totalorder %v513_v61, 15 }
 0x208   : > { %v3278_v3 = vadd.f32 %v3246_v9, %v2378_v41  ;;  %3299 = vxpose.xlu0.b32.cont [11/16] (narrow) %v5166_v26, 32  ;;  %3323 = vxpose.xlu1.b32.cont [3/16] (narrow) %v3275_v27, 32  ;;  %v333_v26 = vadd.s32 248, %v5114_v0  ;;  %v541_v0 = vand.u32 15, %v331_v15 }
 0x209   : > { %v4224_v35 = vpop.f32.mrb[56].mxu0 }
 0x20a   : > { %v4122_v2 = vpop.f32.mrb[56].mxu1  ;;  %v3066_v63 = vpop.f32.mrb[57].mxu0  ;;  %v555_v44 = vand.u32 15, %v333_v26  ;;  %vm3158_vm1 = vcmp.lt.s32.totalorder %v541_v0, 15 }
 0x20b   : > { %v2383_v29 = vadd.f32 %v4122_v2, %v1579_v37  ;;  %v2294_v33 = vpop.f32.mrb[57].mxu1  ;;  %v4225_v16 = vpop.f32.mrb[58].mxu0 }
 0x20c   : > { %v2381_v27 = vadd.f32 %v2294_v33, %v1577_v13  ;;  %v3069_v19 = vpop.f32.mrb[59].mxu0  ;;  %3300 = vxpose.xlu0.b32.cont [12/16] (narrow) %v5177_v34, 32  ;;  %3324 = vxpose.xlu1.b32.cont [4/16] (narrow) %v3276_v51, 32  ;;  %v4123_v22 = vpop.f32.mrb[58].mxu1  ;;  %v3252_v45 = vsel %vm5261_vm12, %v4225_v16, 0.0  ;;  %vm3160_vm0 = vcmp.lt.s32.totalorder %v555_v44, 15 }
 0x20d   : > { %v3283_v31 = vadd.f32 %v4224_v35, %v2383_v29  ;;  %v2384_v25 = vadd.f32 %v5102_v17, %v4123_v22  ;;  %v2297_v20 = vpop.f32.mrb[59].mxu1  ;;  %v3250_v42 = vsel %vm3154_vm13, %v3069_v19, 0.0  ;;  %v1583_v17 = vsel %vm1487_vm14, %v5106_v5, 0.0 }
 0x20e   : > { %v3281_v36 = vadd.f32 %v3066_v63, %v2381_v27  ;;  %v2382_v4 = vadd.f32 %v5104_v47, %v2297_v20 }
 0x20f   : > { %v3284_v43 = vadd.f32 %v3252_v45, %v2384_v25 }
 0x210   : > { %v3282_v53 = vadd.f32 %v3250_v42, %v2382_v4  ;;  %3301 = vxpose.xlu0.b32.cont [13/16] (narrow) %v5197_v1, 32  ;;  %3325 = vxpose.xlu1.b32.cont [5/16] (narrow) %v3277_v10, 32 }
 0x211   : > { %v4228_v34 = vpop.f32.mrb[60].mxu0 }
 0x212   : > { %v4126_v51 = vpop.f32.mrb[60].mxu1  ;;  %v3082_v38 = vpop.f32.mrb[61].mxu0 }
 0x213   : > { %v2387_v52 = vadd.f32 %v4126_v51, %v1583_v17  ;;  %v2310_v39 = vpop.f32.mrb[61].mxu1  ;;  %v4229_v47 = vpop.f32.mrb[62].mxu0 }
 0x214   : > { %v2385_v18 = vadd.f32 %v2310_v39, %v1581_v49  ;;  %v3085_v55 = vpop.f32.mrb[63].mxu0  ;;  %3302 = vxpose.xlu0.b32.cont [14/16] (narrow) %v5207_v46, 32  ;;  %3326 = vxpose.xlu1.b32.cont [6/16] (narrow) %v3278_v3, 32  ;;  %v4127_v1 = vpop.f32.mrb[62].mxu1  ;;  %v3256_v57 = vsel %vm3160_vm0, %v4229_v47, 0.0  ;;  %v3387_v46 = vld [vmem:[%s5356_s3 + $0x10] sm:$0xff] }
 0x215   : > { %v3287_v8 = vadd.f32 %v4228_v34, %v2387_v52  ;;  %v2388_v32 = vadd.f32 %v5110_v40, %v4127_v1  ;;  %v2313_v24 = vpop.f32.mrb[63].mxu1  ;;  %v3254_v58 = vsel %vm3158_vm1, %v3085_v55, 0.0  ;;  %v3388_v40 = vld [vmem:[%s5356_s3 + $0x18] sm:$0xff] }
 0x216   : > { %v3285_v5 = vadd.f32 %v3082_v38, %v2385_v18  ;;  %v2386_v56 = vadd.f32 %v5112_v50, %v2313_v24  ;;  %v3365_v50 = vpop.permute.xlu1 %3364 }
 0x217   : > { %v3288_v7 = vadd.f32 %v3256_v57, %v2388_v32 }
 0x218   : > { %v3286_v59 = vadd.f32 %v3254_v58, %v2386_v56  ;;  %3303 = vxpose.xlu0.b32.cont [15/16] (narrow) %v5194_v30, 32  ;;  %3327 = vxpose.xlu1.b32.cont [7/16] (narrow) %v5246_v6, 32 }
 0x21a   : > { %v3370_v30 = vpop.permute.xlu1 %3369 }
 0x21c   : > { %3304 = vxpose.xlu0.b32.end [16/16] (narrow) %v5205_v54, 32  ;;  %3328 = vxpose.xlu1.b32.cont [8/16] (narrow) %v5256_v28, 32  ;;  %v3360_v54 = vpop.permute.xlu0 %3359 }
 0x21e   : > { %v3375_v6 = vpop.permute.xlu1 %3374 }
 0x220   : > { %3329 = vxpose.xlu1.b32.cont [9/16] (narrow) %v3281_v36, 32  ;;  %v3397_v60 = vpop.permute.xlu0 %3396 }
 0x222   : > { %v3392_v11 = vpop.permute.xlu1 %3391 }
 0x224   : > { %3330 = vxpose.xlu1.b32.cont [10/16] (narrow) %v3282_v53, 32 }
 0x228   : > { %3331 = vxpose.xlu1.b32.cont [11/16] (narrow) %v3283_v31, 32 }
 0x22c   : > { %3332 = vxpose.xlu1.b32.cont [12/16] (narrow) %v3284_v43, 32 }
 0x230   : > { %3333 = vxpose.xlu1.b32.cont [13/16] (narrow) %v3285_v5, 32 }
 0x234   : > { %3334 = vxpose.xlu1.b32.cont [14/16] (narrow) %v3286_v59, 32 }
 0x238   : > { %3335 = vxpose.xlu1.b32.cont [15/16] (narrow) %v3287_v8, 32 }
 0x23c   : > { %3336 = vxpose.xlu1.b32.end [16/16] (narrow) %v3288_v7, 32 }
 0x245   : > { %3406 = vperm.xlu0 %4467, %v3388_v40  }
 0x25a   : > { %3401 = vperm.xlu1 %4468, %v3387_v46  }
 0x260   : > { %v3305_v62 = vpop.trf.xlu0 }
 0x261   : > { %v3377_v10 = vmul.f32 %v3360_v54, %v3305_v62 }
 0x263   : > { %v3409_v41 = vadd.f32 %v3392_v11, %v3377_v10 }
 0x264   : > { %v3306_v12 = vpop.trf.xlu0 }
 0x265   : > { %v3417_v9 = vmax.f32 %v3409_v41, 0.0  ;;  %v3379_v28 = vmul.f32 %v3365_v50, %v3306_v12 }
 0x267   : > { %3425 = vst [vmem:[%s5291_s8] sm:$0xff] %v3417_v9  ;;  %v3411_v14 = vadd.f32 %v3397_v60, %v3379_v28 }
 0x268   : > { %v3307_v13 = vpop.trf.xlu0 }
 0x269   : > { %v3419_v3 = vmax.f32 %v3411_v14, 0.0  ;;  %v3381_v20 = vmul.f32 %v3370_v30, %v3307_v13 }
 0x26b   : > { %3427 = vst [vmem:[%s5291_s8 + $0x10] sm:$0xff] %v3419_v3 }
 0x26c   : > { %v3308_v16 = vpop.trf.xlu0 }
 0x26d   : > { %v3383_v26 = vmul.f32 %v3375_v6, %v3308_v16 }
 0x280   : > { %v3337_v61 = vpop.trf.xlu1 }
 0x281   : > { %v3378_v35 = vmul.f32 %v3360_v54, %v3337_v61 }
 0x283   : > { %v3410_v37 = vadd.f32 %v3392_v11, %v3378_v35 }
 0x284   : > { %v3338_v2 = vpop.trf.xlu1 }
 0x285   : > { %v3418_v63 = vmax.f32 %v3410_v37, 0.0  ;;  %v3380_v48 = vmul.f32 %v3365_v50, %v3338_v2 }
 0x287   : > { %3426 = vst [vmem:[%s5291_s8 + $0x8] sm:$0xff] %v3418_v63  ;;  %v3412_v21 = vadd.f32 %v3397_v60, %v3380_v48 }
 0x288   : > { %v3339_v33 = vpop.trf.xlu1 }
 0x289   : > { %v3420_v29 = vmax.f32 %v3412_v21, 0.0  ;;  %v3382_v36 = vmul.f32 %v3370_v30, %v3339_v33 }
 0x28b   : > { %3428 = vst [vmem:[%s5291_s8 + $0x18] sm:$0xff] %v3420_v29 }
 0x28c   : > { %v3340_v23 = vpop.trf.xlu1 }
 0x28d   : > { %v3384_v27 = vmul.f32 %v3375_v6, %v3340_v23 }
 0x2c4   : > { %v3407_v19 = vpop.permute.xlu0 %3406 }
 0x2c5   : > { %v3415_v22 = vadd.f32 %v3407_v19, %v3383_v26  ;;  %v3416_v15 = vadd.f32 %v3407_v19, %v3384_v27 }
 0x2c7   : > { %v3423_v31 = vmax.f32 %v3415_v22, 0.0  ;;  %v3424_v25 = vmax.f32 %v3416_v15, 0.0 }
 0x2c9   : > { %3431 = vst [vmem:[%s5291_s8 + $0x30] sm:$0xff] %v3423_v31  ;;  %3432 = vst [vmem:[%s5291_s8 + $0x38] sm:$0xff] %v3424_v25 }
 0x2d9   : > { %v3402_v45 = vpop.permute.xlu1 %3401 }
 0x2da   : > { %v3413_v4 = vadd.f32 %v3402_v45, %v3381_v20  ;;  %v3414_v42 = vadd.f32 %v3402_v45, %v3382_v36 }
 0x2dc   : > { %v3421_v43 = vmax.f32 %v3413_v4, 0.0  ;;  %v3422_v44 = vmax.f32 %v3414_v42, 0.0 }
 0x2de   : > { %3429 = vst [vmem:[%s5291_s8 + $0x20] sm:$0xff] %v3421_v43  ;;  %3430 = vst [vmem:[%s5291_s8 + $0x28] sm:$0xff] %v3422_v44 }
 0x2df   : > { %4491 = shalt.err (!%p4488_p3)
}
 0x2e0   : > { %s4492_s27 = scalar_lea.hbm %s5304_s13, 1024  ;;  %s4496_s30 = scalar_lea.hbm %s5357_s4, 2048 }
 0x2e1   : > { %p4493_p4 = scmp.ne.s32.totalorder %s5304_s13, %s4492_s27  ;;  %p4497_p9 = scmp.lt.u32.totalorder %s5304_s13, %s5357_s4 }
 0x2e2   : > { %p4498_p10 = scmp.lt.u32.totalorder %s4496_s30, %s4492_s27  ;;  %p4500_p12 = scmp.lt.u32.totalorder %s4492_s27, %s5304_s13 }
 0x2e3   : > { %p4494_p7 = pnand %p4493_p4, %p4610_p5 }
 0x2e4   : > { %p4499_p11 = por %p4498_p10, %p4497_p9 }
 0x2e5   : > { %p4495_p8 = pneg %p4494_p7 }
 0x2e6   : > { %p4501_p13 = por %p4500_p12, %p4499_p11 }
 0x2e8   : > { %p4502_p0 = pnand %p4501_p13, %p4495_p8 }
 0x2ea   : > { %4505 = shalt.err (!%p4502_p0)
}
 0x2eb   : > { %s4545_s7 = smov 256   ;;  %s4546_s8 = smov 16  }
 0x2ec   : > { %4424 = dma.vmem_to_hbm [thread:$0]  (%p4610_p5), %s5306_s10, 1024, %s5304_s13, %s5312_s19, %s4545_s7, %s4545_s7, %s4546_s8  }
 0x2ed PF: > { %p4430_p1 = scmp.ge.s32.totalorder %s4540_s18, 2  ;;  %s3462_s9 = sand.u32 1, %s4528_s15  }
 0x2ee   : > { %s3463_s11 = scalar_lea.sflag [#allocation4], %s3462_s9 }
 0x2ef   : > { %p4427_p2 = pnand %p4430_p1, %p4614_p6 }
 0x2f1   : > { %4523 = dma.done.wait (!%p4427_p2), %s3463_s11, 1024  }
 0x2f2   : > { %4525 = vsyncadd (!%p4427_p2), %s3463_s11, 4294966272  ;;  %p14_p3 = scmp.ge.s32.totalorder %s4597_s21, 4   ;;  %s5382_s15 = smov %s4532_s16 }
 0x2f3   : > { %s5383_s16 = smov %s4536_s17  ;;  %s5384_s17 = smov %s4608_s24 }
 0x2f4   : > { %s5385_s18 = smov %s4597_s21  ;;  %16 = sbr.rel (!%p14_p3) target bundleno = 3 (0x3), region = 79 }
 0x2fb   :  { %3468 = vsyncpa [#allocation4], 1 }
 0x2fc   :  { %3470 = vsyncpa [#allocation4 + $0x1], 1 }

</bundles_post_ra>
